<compile_context>
chip_gen: v7x
topology: tpu7x:2x2x1
jax: 0.10.0
libtpu: 0.0.40
codegen_flags: <defaults>
</compile_context>

<pallas_src>
import jax
import jax.numpy as jnp
from jax.experimental import pallas as pl
from jax.experimental.pallas import tpu as pltpu


def _round_up(n, m):
    return ((n + m - 1) // m) * m


# ----------------------------------------------------------------------------
# Pallas kernel: full GRU recurrence over one time-chunk per grid step
# ----------------------------------------------------------------------------
def gru_kernel(x_ref, h0_ref, wx_ref, whzr_ref, whh_ref, b_ref, out_ref, h_scr):
    """Grid axis 0 = time chunks (sequential carry in VMEM scratch).

    x_ref    : (Tc, B, I)     inputs for this time chunk
    h0_ref   : (B, Hp)        initial hidden state (padded)
    wx_ref   : (I, 3*Hp)      [W_xz | W_xr | W_xh] (padded, packed once)
    whzr_ref : (Hp, 2*Hp)     [W_hz | W_hr]        (padded, packed once)
    whh_ref  : (Hp, Hp)       W_hh                 (padded)
    b_ref    : (1, 3*Hp)      [b_z | b_r | b_h]    (padded, float32)
    out_ref  : (Tc, B, Hp)    hidden states emitted for this chunk
    h_scr    : (B, Hp) f32    VMEM scratch carrying H across grid steps
    """
    Tc, B, I = x_ref.shape
    Hp = h_scr.shape[-1]
    mm_dtype = wx_ref.dtype  # bf16 on v6e/v7x if requested; f32 otherwise

    @pl.when(pl.program_id(0) == 0)
    def _():
        h_scr[...] = h0_ref[...]

    # --- Hoisted input projection for the whole chunk: one wide MXU matmul ----
    x_flat = x_ref[...].reshape(Tc * B, I)
    gi = jnp.dot(x_flat.astype(mm_dtype), wx_ref[...],
                 preferred_element_type=jnp.float32) + b_ref[...]
    # gate order along the 3*Hp axis: [z | r | h_tilde]

    # --- Sequential recurrence (Tc small & static -> fully unrolled) ----------
    h = h_scr[...]
    for t in range(Tc):
        g = gi[t * B:(t + 1) * B]                                  # (B, 3Hp)
        gh = jnp.dot(h.astype(mm_dtype), whzr_ref[...],
                     preferred_element_type=jnp.float32)           # (B, 2Hp)
        z = jax.nn.sigmoid(g[:, :Hp] + gh[:, :Hp])
        r = jax.nn.sigmoid(g[:, Hp:2 * Hp] + gh[:, Hp:])
        h_tilde = jnp.tanh(
            g[:, 2 * Hp:]
            + jnp.dot((r * h).astype(mm_dtype), whh_ref[...],
                      preferred_element_type=jnp.float32))
        h = h_tilde + z * (h - h_tilde)        # == Z*H + (1-Z)*H_tilde
        out_ref[t] = h.astype(out_ref.dtype)

    h_scr[...] = h


# ----------------------------------------------------------------------------
# One-time parameter packing (pad hidden dim to 128, fuse gate weights)
# ----------------------------------------------------------------------------
def pack_gru_params(params, param_dtype=jnp.float32):
    """param_dtype=jnp.bfloat16 enables bf16 matmul inputs on v6e/v7x."""
    I, H = params["W_xz"].shape
    Hp = _round_up(H, 128)

    pad_c = lambda w: jnp.pad(w, ((0, 0), (0, Hp - H)))           # pad out cols
    pad_rc = lambda w: jnp.pad(w, ((0, Hp - H), (0, Hp - H)))     # pad rows+cols
    pad_b = lambda b: jnp.pad(b, (0, Hp - H))

    wx = jnp.concatenate([pad_c(params["W_xz"]),
                          pad_c(params["W_xr"]),
                          pad_c(params["W_xh"])], axis=1)          # (I, 3Hp)
    whzr = jnp.concatenate([pad_rc(params["W_hz"]),
                            pad_rc(params["W_hr"])], axis=1)       # (Hp, 2Hp)
    whh = pad_rc(params["W_hh"])                                   # (Hp, Hp)
    b = jnp.concatenate([pad_b(params["b_z"]),
                         pad_b(params["b_r"]),
                         pad_b(params["b_h"])]).reshape(1, 3 * Hp)  # (1, 3Hp)

    return {
        "wx": wx.astype(param_dtype),
        "whzr": whzr.astype(param_dtype),
        "whh": whh.astype(param_dtype),
        "b": b.astype(jnp.float32),          # bias add stays f32
        "H": H, "Hp": Hp, "I": I,
    }


# ----------------------------------------------------------------------------
# Forward wrapper
# ----------------------------------------------------------------------------
def gru_scratch_forward(packed, x, H0=None, t_chunk=8):
    """x: (T, B, num_inputs) float32.  Returns (outputs (T,B,H), final H (B,H))."""
    T, B, I = x.shape
    Hn, Hp = packed["H"], packed["Hp"]

    if H0 is None:
        # Faithful to the reference module (uses inputs.shape[0]); valid when T == B.
        H0 = jnp.zeros((x.shape[0], Hn), dtype=x.dtype)
    h0p = jnp.pad(H0.astype(jnp.float32), ((0, 0), (0, Hp - Hn)))

    t_chunk = min(t_chunk, T)
    assert T % t_chunk == 0, "t_chunk must divide seq_len"
    grid = (T // t_chunk,)

    out = pl.pallas_call(
        gru_kernel,
        out_shape=jax.ShapeDtypeStruct((T, B, Hp), jnp.float32),
        grid_spec=pltpu.PrefetchScalarGridSpec(
            num_scalar_prefetch=0,
            grid=grid,
            in_specs=[
                pl.BlockSpec((t_chunk, B, I), lambda c: (c, 0, 0)),   # x chunk
                pl.BlockSpec((B, Hp), lambda c: (0, 0)),              # h0
                pl.BlockSpec((I, 3 * Hp), lambda c: (0, 0)),          # wx
                pl.BlockSpec((Hp, 2 * Hp), lambda c: (0, 0)),         # whzr
                pl.BlockSpec((Hp, Hp), lambda c: (0, 0)),             # whh
                pl.BlockSpec((1, 3 * Hp), lambda c: (0, 0)),          # bias
            ],
            out_specs=pl.BlockSpec((t_chunk, B, Hp), lambda c: (c, 0, 0)),
            scratch_shapes=[pltpu.VMEM((B, Hp), jnp.float32)],
        ),
        compiler_params=pltpu.CompilerParams(
            dimension_semantics=("arbitrary",)),   # time is a sequential carry
    )(x, h0p, packed["wx"], packed["whzr"], packed["whh"], packed["b"])

    outputs = out[:, :, :Hn]          # drop the zero-padded lanes
    return outputs, outputs[-1]       # final H == last emitted hidden state
    # TODO(synk): for very large batch on v7x, add a batch grid axis marked
    # "parallel" so the second TensorCore is used; B=8 here makes it moot.


# ----------------------------------------------------------------------------
# Pure-JAX reference (mirrors the PyTorch module line by line)
# ----------------------------------------------------------------------------
def gru_scratch_reference(params, x, H=None):
    if H is None:
        H = jnp.zeros((x.shape[0], params["W_xz"].shape[1]), dtype=x.dtype)
    outs = []
    for X in x:
        Z = jax.nn.sigmoid(X @ params["W_xz"] + H @ params["W_hz"] + params["b_z"])
        R = jax.nn.sigmoid(X @ params["W_xr"] + H @ params["W_hr"] + params["b_r"])
        H_tilde = jnp.tanh(X @ params["W_xh"] + (R * H) @ params["W_hh"] + params["b_h"])
        H = Z * H + (1 - Z) * H_tilde
        outs.append(H)
    return jnp.stack(outs), H


# ----------------------------------------------------------------------------
# Deterministic init (matches the module: randn * sigma, zero biases)
# ----------------------------------------------------------------------------
def init_params(key, num_inputs, num_hiddens, sigma=0.01):
    ks = jax.random.split(key, 6)
    f = jnp.float32
    return {
        "W_xz": jax.random.normal(ks[0], (num_inputs, num_hiddens), f) * sigma,
        "W_hz": jax.random.normal(ks[1], (num_hiddens, num_hiddens), f) * sigma,
        "b_z": jnp.zeros((num_hiddens,), f),
        "W_xr": jax.random.normal(ks[2], (num_inputs, num_hiddens), f) * sigma,
        "W_hr": jax.random.normal(ks[3], (num_hiddens, num_hiddens), f) * sigma,
        "b_r": jnp.zeros((num_hiddens,), f),
        "W_xh": jax.random.normal(ks[4], (num_inputs, num_hiddens), f) * sigma,
        "W_hh": jax.random.normal(ks[5], (num_hiddens, num_hiddens), f) * sigma,
        "b_h": jnp.zeros((num_hiddens,), f),
    }


if __name__ == "__main__":
    # seq_len == batch so the reference module's H init (inputs.shape[0]) is valid.
    seq_len = 8
    batch = 8
    num_inputs = 16
    num_hiddens = 32

    key = jax.random.PRNGKey(0)
    kx, kp = jax.random.split(key)
    x = jax.random.normal(kx, (seq_len, batch, num_inputs), dtype=jnp.float32)
    params = init_params(kp, num_inputs, num_hiddens)

    # Pack / pad weights once (use param_dtype=jnp.bfloat16 on v6e/v7x for 2x MXU).
    packed = pack_gru_params(params, param_dtype=jnp.float32)

    outputs, h_final = gru_scratch_forward(packed, x)
    jax.block_until_ready((outputs, h_final))

    assert outputs.shape == (seq_len, batch, num_hiddens)
    assert h_final.shape == (batch, num_hiddens)
    assert outputs.dtype == jnp.float32

    # Correctness check against the line-by-line JAX reference.
    ref_out, ref_h = gru_scratch_reference(params, x)
    err = float(jnp.max(jnp.abs(outputs - ref_out)))
    err_h = float(jnp.max(jnp.abs(h_final - ref_h)))
    assert err < 2e-4 and err_h < 2e-4, (err, err_h)

    print("KERNEL_OK")
</pallas_src>

<mosaic_0001>
module attributes {stable_mosaic.version = 11 : i64} {
  func.func @gru_kernel(%arg0: i32, %arg1: memref<8x8x16xf32, #tpu.memory_space<vmem>>, %arg2: memref<8x128xf32, #tpu.memory_space<vmem>>, %arg3: memref<16x384xf32, #tpu.memory_space<vmem>>, %arg4: memref<128x256xf32, #tpu.memory_space<vmem>>, %arg5: memref<128x128xf32, #tpu.memory_space<vmem>>, %arg6: memref<1x384xf32, #tpu.memory_space<vmem>>, %arg7: memref<8x8x128xf32, #tpu.memory_space<vmem>>, %arg8: memref<8x128xf32, #tpu.memory_space<vmem>>) attributes {dimension_semantics = [#tpu.dimension_semantics<arbitrary>], iteration_bounds = array<i64: 1>, scalar_prefetch = 0 : i64, scratch_operands = 1 : i64, tpu.core_type = #tpu.core_type<tc>, window_params = [{transform_indices = @transform_0, window_bounds = array<i64: 8, 8, 16>}, {pipeline_mode = #tpu.pipeline_mode<synchronous>, transform_indices = @transform_1, window_bounds = array<i64: 8, 128>}, {pipeline_mode = #tpu.pipeline_mode<synchronous>, transform_indices = @transform_2, window_bounds = array<i64: 16, 384>}, {pipeline_mode = #tpu.pipeline_mode<synchronous>, transform_indices = @transform_3, window_bounds = array<i64: 128, 256>}, {pipeline_mode = #tpu.pipeline_mode<synchronous>, transform_indices = @transform_4, window_bounds = array<i64: 128, 128>}, {pipeline_mode = #tpu.pipeline_mode<synchronous>, transform_indices = @transform_5, window_bounds = array<i64: 1, 384>}, {transform_indices = @transform_6, window_bounds = array<i64: 8, 8, 128>}]} {
    %c0_i32 = arith.constant 0 : i32
    %0 = arith.cmpi eq, %arg0, %c0_i32 : i32
    %1 = arith.extui %0 : i1 to i32
    %c0_i32_0 = arith.constant 0 : i32
    %2 = arith.cmpi ne, %1, %c0_i32_0 : i32
    scf.if %2 {
      %c0_92 = arith.constant 0 : index
      %c0_93 = arith.constant 0 : index
      %260 = vector.load %arg2[%c0_92, %c0_93] : memref<8x128xf32, #tpu.memory_space<vmem>>, vector<8x128xf32>
      %c0_94 = arith.constant 0 : index
      %c0_95 = arith.constant 0 : index
      %261 = vector.load %arg8[%c0_94, %c0_95] : memref<8x128xf32, #tpu.memory_space<vmem>>, vector<8x128xf32>
      tpu.vector_store %arg8[%c0_94, %c0_95], %260 {strides = array<i32>} : memref<8x128xf32, #tpu.memory_space<vmem>>, vector<8x128xf32>,
    } else {
    }
    %c0 = arith.constant 0 : index
    %c0_1 = arith.constant 0 : index
    %c0_2 = arith.constant 0 : index
    %3 = vector.load %arg1[%c0, %c0_1, %c0_2] : memref<8x8x16xf32, #tpu.memory_space<vmem>>, vector<8x8x16xf32>
    %4 = vector.shape_cast %3 : vector<8x8x16xf32> to vector<64x16xf32>
    %c0_3 = arith.constant 0 : index
    %c0_4 = arith.constant 0 : index
    %5 = vector.load %arg3[%c0_3, %c0_4] : memref<16x384xf32, #tpu.memory_space<vmem>>, vector<16x384xf32>
    %cst = arith.constant dense<0.000000e+00> : vector<64x384xf32>
    %6 = tpu.matmul %4, %5, %cst {dimension_numbers = #tpu.dot_dimension_numbers<[1], [0], [0], [1], [0, 0, 1, 1], [], []>} : vector<64x16xf32>, vector<16x384xf32>, vector<64x384xf32> -> vector<64x384xf32>
    %c0_5 = arith.constant 0 : index
    %c0_6 = arith.constant 0 : index
    %7 = vector.load %arg6[%c0_5, %c0_6] : memref<1x384xf32, #tpu.memory_space<vmem>>, vector<1x384xf32>
    %8 = vector.broadcast %7 : vector<1x384xf32> to vector<64x384xf32>
    %9 = arith.addf %6, %8 : vector<64x384xf32>
    %c0_7 = arith.constant 0 : index
    %c0_8 = arith.constant 0 : index
    %10 = vector.load %arg8[%c0_7, %c0_8] : memref<8x128xf32, #tpu.memory_space<vmem>>, vector<8x128xf32>
    %11 = vector.extract_strided_slice %9 {offsets = [0, 0], sizes = [8, 384], strides = [1, 1]} : vector<64x384xf32> to vector<8x384xf32>
    %c0_9 = arith.constant 0 : index
    %c0_10 = arith.constant 0 : index
    %12 = vector.load %arg4[%c0_9, %c0_10] : memref<128x256xf32, #tpu.memory_space<vmem>>, vector<128x256xf32>
    %cst_11 = arith.constant dense<0.000000e+00> : vector<8x256xf32>
    %13 = tpu.matmul %10, %12, %cst_11 {dimension_numbers = #tpu.dot_dimension_numbers<[1], [0], [0], [1], [0, 0, 1, 1], [], []>} : vector<8x128xf32>, vector<128x256xf32>, vector<8x256xf32> -> vector<8x256xf32>
    %14 = vector.extract_strided_slice %11 {offsets = [0, 0], sizes = [8, 128], strides = [1, 1]} : vector<8x384xf32> to vector<8x128xf32>
    %15 = vector.extract_strided_slice %13 {offsets = [0, 0], sizes = [8, 128], strides = [1, 1]} : vector<8x256xf32> to vector<8x128xf32>
    %16 = arith.addf %14, %15 : vector<8x128xf32>
    %17 = arith.negf %16 : vector<8x128xf32>
    %18 = math.exp %17 : vector<8x128xf32>
    %cst_12 = arith.constant 1.000000e+00 : f32
    %19 = vector.broadcast %cst_12 : f32 to vector<8x128xf32>
    %20 = arith.addf %19, %18 : vector<8x128xf32>
    %21 = arith.divf %19, %20 : vector<8x128xf32>
    %22 = vector.extract_strided_slice %11 {offsets = [0, 128], sizes = [8, 128], strides = [1, 1]} : vector<8x384xf32> to vector<8x128xf32>
    %23 = vector.extract_strided_slice %13 {offsets = [0, 128], sizes = [8, 128], strides = [1, 1]} : vector<8x256xf32> to vector<8x128xf32>
    %24 = arith.addf %22, %23 : vector<8x128xf32>
    %25 = arith.negf %24 : vector<8x128xf32>
    %26 = math.exp %25 : vector<8x128xf32>
    %cst_13 = arith.constant 1.000000e+00 : f32
    %27 = vector.broadcast %cst_13 : f32 to vector<8x128xf32>
    %28 = arith.addf %27, %26 : vector<8x128xf32>
    %29 = arith.divf %27, %28 : vector<8x128xf32>
    %30 = vector.extract_strided_slice %11 {offsets = [0, 256], sizes = [8, 128], strides = [1, 1]} : vector<8x384xf32> to vector<8x128xf32>
    %31 = arith.mulf %29, %10 : vector<8x128xf32>
    %c0_14 = arith.constant 0 : index
    %c0_15 = arith.constant 0 : index
    %32 = vector.load %arg5[%c0_14, %c0_15] : memref<128x128xf32, #tpu.memory_space<vmem>>, vector<128x128xf32>
    %cst_16 = arith.constant dense<0.000000e+00> : vector<8x128xf32>
    %33 = tpu.matmul %31, %32, %cst_16 {dimension_numbers = #tpu.dot_dimension_numbers<[1], [0], [0], [1], [0, 0, 1, 1], [], []>} : vector<8x128xf32>, vector<128x128xf32>, vector<8x128xf32> -> vector<8x128xf32>
    %34 = arith.addf %30, %33 : vector<8x128xf32>
    %35 = math.tanh %34 : vector<8x128xf32>
    %36 = arith.subf %10, %35 : vector<8x128xf32>
    %37 = arith.mulf %21, %36 : vector<8x128xf32>
    %38 = arith.addf %35, %37 : vector<8x128xf32>
    %c0_17 = arith.constant 0 : index
    %c0_18 = arith.constant 0 : index
    %c0_19 = arith.constant 0 : index
    %39 = vector.load %arg7[%c0_17, %c0_18, %c0_19] : memref<8x8x128xf32, #tpu.memory_space<vmem>>, vector<1x8x128xf32>
    %40 = vector.shape_cast %39 : vector<1x8x128xf32> to vector<8x128xf32>
    %41 = vector.shape_cast %38 : vector<8x128xf32> to vector<1x8x128xf32>
    tpu.vector_store %arg7[%c0_17, %c0_18, %c0_19], %41 {strides = array<i32>} : memref<8x8x128xf32, #tpu.memory_space<vmem>>, vector<1x8x128xf32>,
    %42 = vector.extract_strided_slice %9 {offsets = [8, 0], sizes = [8, 384], strides = [1, 1]} : vector<64x384xf32> to vector<8x384xf32>
    %c0_20 = arith.constant 0 : index
    %c0_21 = arith.constant 0 : index
    %43 = vector.load %arg4[%c0_20, %c0_21] : memref<128x256xf32, #tpu.memory_space<vmem>>, vector<128x256xf32>
    %cst_22 = arith.constant dense<0.000000e+00> : vector<8x256xf32>
    %44 = tpu.matmul %38, %43, %cst_22 {dimension_numbers = #tpu.dot_dimension_numbers<[1], [0], [0], [1], [0, 0, 1, 1], [], []>} : vector<8x128xf32>, vector<128x256xf32>, vector<8x256xf32> -> vector<8x256xf32>
    %45 = vector.extract_strided_slice %42 {offsets = [0, 0], sizes = [8, 128], strides = [1, 1]} : vector<8x384xf32> to vector<8x128xf32>
    %46 = vector.extract_strided_slice %44 {offsets = [0, 0], sizes = [8, 128], strides = [1, 1]} : vector<8x256xf32> to vector<8x128xf32>
    %47 = arith.addf %45, %46 : vector<8x128xf32>
    %48 = arith.negf %47 : vector<8x128xf32>
    %49 = math.exp %48 : vector<8x128xf32>
    %cst_23 = arith.constant 1.000000e+00 : f32
    %50 = vector.broadcast %cst_23 : f32 to vector<8x128xf32>
    %51 = arith.addf %50, %49 : vector<8x128xf32>
    %52 = arith.divf %50, %51 : vector<8x128xf32>
    %53 = vector.extract_strided_slice %42 {offsets = [0, 128], sizes = [8, 128], strides = [1, 1]} : vector<8x384xf32> to vector<8x128xf32>
    %54 = vector.extract_strided_slice %44 {offsets = [0, 128], sizes = [8, 128], strides = [1, 1]} : vector<8x256xf32> to vector<8x128xf32>
    %55 = arith.addf %53, %54 : vector<8x128xf32>
    %56 = arith.negf %55 : vector<8x128xf32>
    %57 = math.exp %56 : vector<8x128xf32>
    %cst_24 = arith.constant 1.000000e+00 : f32
    %58 = vector.broadcast %cst_24 : f32 to vector<8x128xf32>
    %59 = arith.addf %58, %57 : vector<8x128xf32>
    %60 = arith.divf %58, %59 : vector<8x128xf32>
    %61 = vector.extract_strided_slice %42 {offsets = [0, 256], sizes = [8, 128], strides = [1, 1]} : vector<8x384xf32> to vector<8x128xf32>
    %62 = arith.mulf %60, %38 : vector<8x128xf32>
    %c0_25 = arith.constant 0 : index
    %c0_26 = arith.constant 0 : index
    %63 = vector.load %arg5[%c0_25, %c0_26] : memref<128x128xf32, #tpu.memory_space<vmem>>, vector<128x128xf32>
    %cst_27 = arith.constant dense<0.000000e+00> : vector<8x128xf32>
    %64 = tpu.matmul %62, %63, %cst_27 {dimension_numbers = #tpu.dot_dimension_numbers<[1], [0], [0], [1], [0, 0, 1, 1], [], []>} : vector<8x128xf32>, vector<128x128xf32>, vector<8x128xf32> -> vector<8x128xf32>
    %65 = arith.addf %61, %64 : vector<8x128xf32>
    %66 = math.tanh %65 : vector<8x128xf32>
    %67 = arith.subf %38, %66 : vector<8x128xf32>
    %68 = arith.mulf %52, %67 : vector<8x128xf32>
    %69 = arith.addf %66, %68 : vector<8x128xf32>
    %c1 = arith.constant 1 : index
    %c0_28 = arith.constant 0 : index
    %c0_29 = arith.constant 0 : index
    %70 = vector.load %arg7[%c1, %c0_28, %c0_29] : memref<8x8x128xf32, #tpu.memory_space<vmem>>, vector<1x8x128xf32>
    %71 = vector.shape_cast %70 : vector<1x8x128xf32> to vector<8x128xf32>
    %72 = vector.shape_cast %69 : vector<8x128xf32> to vector<1x8x128xf32>
    tpu.vector_store %arg7[%c1, %c0_28, %c0_29], %72 {strides = array<i32>} : memref<8x8x128xf32, #tpu.memory_space<vmem>>, vector<1x8x128xf32>,
    %73 = vector.extract_strided_slice %9 {offsets = [16, 0], sizes = [8, 384], strides = [1, 1]} : vector<64x384xf32> to vector<8x384xf32>
    %c0_30 = arith.constant 0 : index
    %c0_31 = arith.constant 0 : index
    %74 = vector.load %arg4[%c0_30, %c0_31] : memref<128x256xf32, #tpu.memory_space<vmem>>, vector<128x256xf32>
    %cst_32 = arith.constant dense<0.000000e+00> : vector<8x256xf32>
    %75 = tpu.matmul %69, %74, %cst_32 {dimension_numbers = #tpu.dot_dimension_numbers<[1], [0], [0], [1], [0, 0, 1, 1], [], []>} : vector<8x128xf32>, vector<128x256xf32>, vector<8x256xf32> -> vector<8x256xf32>
    %76 = vector.extract_strided_slice %73 {offsets = [0, 0], sizes = [8, 128], strides = [1, 1]} : vector<8x384xf32> to vector<8x128xf32>
    %77 = vector.extract_strided_slice %75 {offsets = [0, 0], sizes = [8, 128], strides = [1, 1]} : vector<8x256xf32> to vector<8x128xf32>
    %78 = arith.addf %76, %77 : vector<8x128xf32>
    %79 = arith.negf %78 : vector<8x128xf32>
    %80 = math.exp %79 : vector<8x128xf32>
    %cst_33 = arith.constant 1.000000e+00 : f32
    %81 = vector.broadcast %cst_33 : f32 to vector<8x128xf32>
    %82 = arith.addf %81, %80 : vector<8x128xf32>
    %83 = arith.divf %81, %82 : vector<8x128xf32>
    %84 = vector.extract_strided_slice %73 {offsets = [0, 128], sizes = [8, 128], strides = [1, 1]} : vector<8x384xf32> to vector<8x128xf32>
    %85 = vector.extract_strided_slice %75 {offsets = [0, 128], sizes = [8, 128], strides = [1, 1]} : vector<8x256xf32> to vector<8x128xf32>
    %86 = arith.addf %84, %85 : vector<8x128xf32>
    %87 = arith.negf %86 : vector<8x128xf32>
    %88 = math.exp %87 : vector<8x128xf32>
    %cst_34 = arith.constant 1.000000e+00 : f32
    %89 = vector.broadcast %cst_34 : f32 to vector<8x128xf32>
    %90 = arith.addf %89, %88 : vector<8x128xf32>
    %91 = arith.divf %89, %90 : vector<8x128xf32>
    %92 = vector.extract_strided_slice %73 {offsets = [0, 256], sizes = [8, 128], strides = [1, 1]} : vector<8x384xf32> to vector<8x128xf32>
    %93 = arith.mulf %91, %69 : vector<8x128xf32>
    %c0_35 = arith.constant 0 : index
    %c0_36 = arith.constant 0 : index
    %94 = vector.load %arg5[%c0_35, %c0_36] : memref<128x128xf32, #tpu.memory_space<vmem>>, vector<128x128xf32>
    %cst_37 = arith.constant dense<0.000000e+00> : vector<8x128xf32>
    %95 = tpu.matmul %93, %94, %cst_37 {dimension_numbers = #tpu.dot_dimension_numbers<[1], [0], [0], [1], [0, 0, 1, 1], [], []>} : vector<8x128xf32>, vector<128x128xf32>, vector<8x128xf32> -> vector<8x128xf32>
    %96 = arith.addf %92, %95 : vector<8x128xf32>
    %97 = math.tanh %96 : vector<8x128xf32>
    %98 = arith.subf %69, %97 : vector<8x128xf32>
    %99 = arith.mulf %83, %98 : vector<8x128xf32>
    %100 = arith.addf %97, %99 : vector<8x128xf32>
    %c2 = arith.constant 2 : index
    %c0_38 = arith.constant 0 : index
    %c0_39 = arith.constant 0 : index
    %101 = vector.load %arg7[%c2, %c0_38, %c0_39] : memref<8x8x128xf32, #tpu.memory_space<vmem>>, vector<1x8x128xf32>
    %102 = vector.shape_cast %101 : vector<1x8x128xf32> to vector<8x128xf32>
    %103 = vector.shape_cast %100 : vector<8x128xf32> to vector<1x8x128xf32>
    tpu.vector_store %arg7[%c2, %c0_38, %c0_39], %103 {strides = array<i32>} : memref<8x8x128xf32, #tpu.memory_space<vmem>>, vector<1x8x128xf32>,
    %104 = vector.extract_strided_slice %9 {offsets = [24, 0], sizes = [8, 384], strides = [1, 1]} : vector<64x384xf32> to vector<8x384xf32>
    %c0_40 = arith.constant 0 : index
    %c0_41 = arith.constant 0 : index
    %105 = vector.load %arg4[%c0_40, %c0_41] : memref<128x256xf32, #tpu.memory_space<vmem>>, vector<128x256xf32>
    %cst_42 = arith.constant dense<0.000000e+00> : vector<8x256xf32>
    %106 = tpu.matmul %100, %105, %cst_42 {dimension_numbers = #tpu.dot_dimension_numbers<[1], [0], [0], [1], [0, 0, 1, 1], [], []>} : vector<8x128xf32>, vector<128x256xf32>, vector<8x256xf32> -> vector<8x256xf32>
    %107 = vector.extract_strided_slice %104 {offsets = [0, 0], sizes = [8, 128], strides = [1, 1]} : vector<8x384xf32> to vector<8x128xf32>
    %108 = vector.extract_strided_slice %106 {offsets = [0, 0], sizes = [8, 128], strides = [1, 1]} : vector<8x256xf32> to vector<8x128xf32>
    %109 = arith.addf %107, %108 : vector<8x128xf32>
    %110 = arith.negf %109 : vector<8x128xf32>
    %111 = math.exp %110 : vector<8x128xf32>
    %cst_43 = arith.constant 1.000000e+00 : f32
    %112 = vector.broadcast %cst_43 : f32 to vector<8x128xf32>
    %113 = arith.addf %112, %111 : vector<8x128xf32>
    %114 = arith.divf %112, %113 : vector<8x128xf32>
    %115 = vector.extract_strided_slice %104 {offsets = [0, 128], sizes = [8, 128], strides = [1, 1]} : vector<8x384xf32> to vector<8x128xf32>
    %116 = vector.extract_strided_slice %106 {offsets = [0, 128], sizes = [8, 128], strides = [1, 1]} : vector<8x256xf32> to vector<8x128xf32>
    %117 = arith.addf %115, %116 : vector<8x128xf32>
    %118 = arith.negf %117 : vector<8x128xf32>
    %119 = math.exp %118 : vector<8x128xf32>
    %cst_44 = arith.constant 1.000000e+00 : f32
    %120 = vector.broadcast %cst_44 : f32 to vector<8x128xf32>
    %121 = arith.addf %120, %119 : vector<8x128xf32>
    %122 = arith.divf %120, %121 : vector<8x128xf32>
    %123 = vector.extract_strided_slice %104 {offsets = [0, 256], sizes = [8, 128], strides = [1, 1]} : vector<8x384xf32> to vector<8x128xf32>
    %124 = arith.mulf %122, %100 : vector<8x128xf32>
    %c0_45 = arith.constant 0 : index
    %c0_46 = arith.constant 0 : index
    %125 = vector.load %arg5[%c0_45, %c0_46] : memref<128x128xf32, #tpu.memory_space<vmem>>, vector<128x128xf32>
    %cst_47 = arith.constant dense<0.000000e+00> : vector<8x128xf32>
    %126 = tpu.matmul %124, %125, %cst_47 {dimension_numbers = #tpu.dot_dimension_numbers<[1], [0], [0], [1], [0, 0, 1, 1], [], []>} : vector<8x128xf32>, vector<128x128xf32>, vector<8x128xf32> -> vector<8x128xf32>
    %127 = arith.addf %123, %126 : vector<8x128xf32>
    %128 = math.tanh %127 : vector<8x128xf32>
    %129 = arith.subf %100, %128 : vector<8x128xf32>
    %130 = arith.mulf %114, %129 : vector<8x128xf32>
    %131 = arith.addf %128, %130 : vector<8x128xf32>
    %c3 = arith.constant 3 : index
    %c0_48 = arith.constant 0 : index
    %c0_49 = arith.constant 0 : index
    %132 = vector.load %arg7[%c3, %c0_48, %c0_49] : memref<8x8x128xf32, #tpu.memory_space<vmem>>, vector<1x8x128xf32>
    %133 = vector.shape_cast %132 : vector<1x8x128xf32> to vector<8x128xf32>
    %134 = vector.shape_cast %131 : vector<8x128xf32> to vector<1x8x128xf32>
    tpu.vector_store %arg7[%c3, %c0_48, %c0_49], %134 {strides = array<i32>} : memref<8x8x128xf32, #tpu.memory_space<vmem>>, vector<1x8x128xf32>,
    %135 = vector.extract_strided_slice %9 {offsets = [32, 0], sizes = [8, 384], strides = [1, 1]} : vector<64x384xf32> to vector<8x384xf32>
    %c0_50 = arith.constant 0 : index
    %c0_51 = arith.constant 0 : index
    %136 = vector.load %arg4[%c0_50, %c0_51] : memref<128x256xf32, #tpu.memory_space<vmem>>, vector<128x256xf32>
    %cst_52 = arith.constant dense<0.000000e+00> : vector<8x256xf32>
    %137 = tpu.matmul %131, %136, %cst_52 {dimension_numbers = #tpu.dot_dimension_numbers<[1], [0], [0], [1], [0, 0, 1, 1], [], []>} : vector<8x128xf32>, vector<128x256xf32>, vector<8x256xf32> -> vector<8x256xf32>
    %138 = vector.extract_strided_slice %135 {offsets = [0, 0], sizes = [8, 128], strides = [1, 1]} : vector<8x384xf32> to vector<8x128xf32>
    %139 = vector.extract_strided_slice %137 {offsets = [0, 0], sizes = [8, 128], strides = [1, 1]} : vector<8x256xf32> to vector<8x128xf32>
    %140 = arith.addf %138, %139 : vector<8x128xf32>
    %141 = arith.negf %140 : vector<8x128xf32>
    %142 = math.exp %141 : vector<8x128xf32>
    %cst_53 = arith.constant 1.000000e+00 : f32
    %143 = vector.broadcast %cst_53 : f32 to vector<8x128xf32>
    %144 = arith.addf %143, %142 : vector<8x128xf32>
    %145 = arith.divf %143, %144 : vector<8x128xf32>
    %146 = vector.extract_strided_slice %135 {offsets = [0, 128], sizes = [8, 128], strides = [1, 1]} : vector<8x384xf32> to vector<8x128xf32>
    %147 = vector.extract_strided_slice %137 {offsets = [0, 128], sizes = [8, 128], strides = [1, 1]} : vector<8x256xf32> to vector<8x128xf32>
    %148 = arith.addf %146, %147 : vector<8x128xf32>
    %149 = arith.negf %148 : vector<8x128xf32>
    %150 = math.exp %149 : vector<8x128xf32>
    %cst_54 = arith.constant 1.000000e+00 : f32
    %151 = vector.broadcast %cst_54 : f32 to vector<8x128xf32>
    %152 = arith.addf %151, %150 : vector<8x128xf32>
    %153 = arith.divf %151, %152 : vector<8x128xf32>
    %154 = vector.extract_strided_slice %135 {offsets = [0, 256], sizes = [8, 128], strides = [1, 1]} : vector<8x384xf32> to vector<8x128xf32>
    %155 = arith.mulf %153, %131 : vector<8x128xf32>
    %c0_55 = arith.constant 0 : index
    %c0_56 = arith.constant 0 : index
    %156 = vector.load %arg5[%c0_55, %c0_56] : memref<128x128xf32, #tpu.memory_space<vmem>>, vector<128x128xf32>
    %cst_57 = arith.constant dense<0.000000e+00> : vector<8x128xf32>
    %157 = tpu.matmul %155, %156, %cst_57 {dimension_numbers = #tpu.dot_dimension_numbers<[1], [0], [0], [1], [0, 0, 1, 1], [], []>} : vector<8x128xf32>, vector<128x128xf32>, vector<8x128xf32> -> vector<8x128xf32>
    %158 = arith.addf %154, %157 : vector<8x128xf32>
    %159 = math.tanh %158 : vector<8x128xf32>
    %160 = arith.subf %131, %159 : vector<8x128xf32>
    %161 = arith.mulf %145, %160 : vector<8x128xf32>
    %162 = arith.addf %159, %161 : vector<8x128xf32>
    %c4 = arith.constant 4 : index
    %c0_58 = arith.constant 0 : index
    %c0_59 = arith.constant 0 : index
    %163 = vector.load %arg7[%c4, %c0_58, %c0_59] : memref<8x8x128xf32, #tpu.memory_space<vmem>>, vector<1x8x128xf32>
    %164 = vector.shape_cast %163 : vector<1x8x128xf32> to vector<8x128xf32>
    %165 = vector.shape_cast %162 : vector<8x128xf32> to vector<1x8x128xf32>
    tpu.vector_store %arg7[%c4, %c0_58, %c0_59], %165 {strides = array<i32>} : memref<8x8x128xf32, #tpu.memory_space<vmem>>, vector<1x8x128xf32>,
    %166 = vector.extract_strided_slice %9 {offsets = [40, 0], sizes = [8, 384], strides = [1, 1]} : vector<64x384xf32> to vector<8x384xf32>
    %c0_60 = arith.constant 0 : index
    %c0_61 = arith.constant 0 : index
    %167 = vector.load %arg4[%c0_60, %c0_61] : memref<128x256xf32, #tpu.memory_space<vmem>>, vector<128x256xf32>
    %cst_62 = arith.constant dense<0.000000e+00> : vector<8x256xf32>
    %168 = tpu.matmul %162, %167, %cst_62 {dimension_numbers = #tpu.dot_dimension_numbers<[1], [0], [0], [1], [0, 0, 1, 1], [], []>} : vector<8x128xf32>, vector<128x256xf32>, vector<8x256xf32> -> vector<8x256xf32>
    %169 = vector.extract_strided_slice %166 {offsets = [0, 0], sizes = [8, 128], strides = [1, 1]} : vector<8x384xf32> to vector<8x128xf32>
    %170 = vector.extract_strided_slice %168 {offsets = [0, 0], sizes = [8, 128], strides = [1, 1]} : vector<8x256xf32> to vector<8x128xf32>
    %171 = arith.addf %169, %170 : vector<8x128xf32>
    %172 = arith.negf %171 : vector<8x128xf32>
    %173 = math.exp %172 : vector<8x128xf32>
    %cst_63 = arith.constant 1.000000e+00 : f32
    %174 = vector.broadcast %cst_63 : f32 to vector<8x128xf32>
    %175 = arith.addf %174, %173 : vector<8x128xf32>
    %176 = arith.divf %174, %175 : vector<8x128xf32>
    %177 = vector.extract_strided_slice %166 {offsets = [0, 128], sizes = [8, 128], strides = [1, 1]} : vector<8x384xf32> to vector<8x128xf32>
    %178 = vector.extract_strided_slice %168 {offsets = [0, 128], sizes = [8, 128], strides = [1, 1]} : vector<8x256xf32> to vector<8x128xf32>
    %179 = arith.addf %177, %178 : vector<8x128xf32>
    %180 = arith.negf %179 : vector<8x128xf32>
    %181 = math.exp %180 : vector<8x128xf32>
    %cst_64 = arith.constant 1.000000e+00 : f32
    %182 = vector.broadcast %cst_64 : f32 to vector<8x128xf32>
    %183 = arith.addf %182, %181 : vector<8x128xf32>
    %184 = arith.divf %182, %183 : vector<8x128xf32>
    %185 = vector.extract_strided_slice %166 {offsets = [0, 256], sizes = [8, 128], strides = [1, 1]} : vector<8x384xf32> to vector<8x128xf32>
    %186 = arith.mulf %184, %162 : vector<8x128xf32>
    %c0_65 = arith.constant 0 : index
    %c0_66 = arith.constant 0 : index
    %187 = vector.load %arg5[%c0_65, %c0_66] : memref<128x128xf32, #tpu.memory_space<vmem>>, vector<128x128xf32>
    %cst_67 = arith.constant dense<0.000000e+00> : vector<8x128xf32>
    %188 = tpu.matmul %186, %187, %cst_67 {dimension_numbers = #tpu.dot_dimension_numbers<[1], [0], [0], [1], [0, 0, 1, 1], [], []>} : vector<8x128xf32>, vector<128x128xf32>, vector<8x128xf32> -> vector<8x128xf32>
    %189 = arith.addf %185, %188 : vector<8x128xf32>
    %190 = math.tanh %189 : vector<8x128xf32>
    %191 = arith.subf %162, %190 : vector<8x128xf32>
    %192 = arith.mulf %176, %191 : vector<8x128xf32>
    %193 = arith.addf %190, %192 : vector<8x128xf32>
    %c5 = arith.constant 5 : index
    %c0_68 = arith.constant 0 : index
    %c0_69 = arith.constant 0 : index
    %194 = vector.load %arg7[%c5, %c0_68, %c0_69] : memref<8x8x128xf32, #tpu.memory_space<vmem>>, vector<1x8x128xf32>
    %195 = vector.shape_cast %194 : vector<1x8x128xf32> to vector<8x128xf32>
    %196 = vector.shape_cast %193 : vector<8x128xf32> to vector<1x8x128xf32>
    tpu.vector_store %arg7[%c5, %c0_68, %c0_69], %196 {strides = array<i32>} : memref<8x8x128xf32, #tpu.memory_space<vmem>>, vector<1x8x128xf32>,
    %197 = vector.extract_strided_slice %9 {offsets = [48, 0], sizes = [8, 384], strides = [1, 1]} : vector<64x384xf32> to vector<8x384xf32>
    %c0_70 = arith.constant 0 : index
    %c0_71 = arith.constant 0 : index
    %198 = vector.load %arg4[%c0_70, %c0_71] : memref<128x256xf32, #tpu.memory_space<vmem>>, vector<128x256xf32>
    %cst_72 = arith.constant dense<0.000000e+00> : vector<8x256xf32>
    %199 = tpu.matmul %193, %198, %cst_72 {dimension_numbers = #tpu.dot_dimension_numbers<[1], [0], [0], [1], [0, 0, 1, 1], [], []>} : vector<8x128xf32>, vector<128x256xf32>, vector<8x256xf32> -> vector<8x256xf32>
    %200 = vector.extract_strided_slice %197 {offsets = [0, 0], sizes = [8, 128], strides = [1, 1]} : vector<8x384xf32> to vector<8x128xf32>
    %201 = vector.extract_strided_slice %199 {offsets = [0, 0], sizes = [8, 128], strides = [1, 1]} : vector<8x256xf32> to vector<8x128xf32>
    %202 = arith.addf %200, %201 : vector<8x128xf32>
    %203 = arith.negf %202 : vector<8x128xf32>
    %204 = math.exp %203 : vector<8x128xf32>
    %cst_73 = arith.constant 1.000000e+00 : f32
    %205 = vector.broadcast %cst_73 : f32 to vector<8x128xf32>
    %206 = arith.addf %205, %204 : vector<8x128xf32>
    %207 = arith.divf %205, %206 : vector<8x128xf32>
    %208 = vector.extract_strided_slice %197 {offsets = [0, 128], sizes = [8, 128], strides = [1, 1]} : vector<8x384xf32> to vector<8x128xf32>
    %209 = vector.extract_strided_slice %199 {offsets = [0, 128], sizes = [8, 128], strides = [1, 1]} : vector<8x256xf32> to vector<8x128xf32>
    %210 = arith.addf %208, %209 : vector<8x128xf32>
    %211 = arith.negf %210 : vector<8x128xf32>
    %212 = math.exp %211 : vector<8x128xf32>
    %cst_74 = arith.constant 1.000000e+00 : f32
    %213 = vector.broadcast %cst_74 : f32 to vector<8x128xf32>
    %214 = arith.addf %213, %212 : vector<8x128xf32>
    %215 = arith.divf %213, %214 : vector<8x128xf32>
    %216 = vector.extract_strided_slice %197 {offsets = [0, 256], sizes = [8, 128], strides = [1, 1]} : vector<8x384xf32> to vector<8x128xf32>
    %217 = arith.mulf %215, %193 : vector<8x128xf32>
    %c0_75 = arith.constant 0 : index
    %c0_76 = arith.constant 0 : index
    %218 = vector.load %arg5[%c0_75, %c0_76] : memref<128x128xf32, #tpu.memory_space<vmem>>, vector<128x128xf32>
    %cst_77 = arith.constant dense<0.000000e+00> : vector<8x128xf32>
    %219 = tpu.matmul %217, %218, %cst_77 {dimension_numbers = #tpu.dot_dimension_numbers<[1], [0], [0], [1], [0, 0, 1, 1], [], []>} : vector<8x128xf32>, vector<128x128xf32>, vector<8x128xf32> -> vector<8x128xf32>
    %220 = arith.addf %216, %219 : vector<8x128xf32>
    %221 = math.tanh %220 : vector<8x128xf32>
    %222 = arith.subf %193, %221 : vector<8x128xf32>
    %223 = arith.mulf %207, %222 : vector<8x128xf32>
    %224 = arith.addf %221, %223 : vector<8x128xf32>
    %c6 = arith.constant 6 : index
    %c0_78 = arith.constant 0 : index
    %c0_79 = arith.constant 0 : index
    %225 = vector.load %arg7[%c6, %c0_78, %c0_79] : memref<8x8x128xf32, #tpu.memory_space<vmem>>, vector<1x8x128xf32>
    %226 = vector.shape_cast %225 : vector<1x8x128xf32> to vector<8x128xf32>
    %227 = vector.shape_cast %224 : vector<8x128xf32> to vector<1x8x128xf32>
    tpu.vector_store %arg7[%c6, %c0_78, %c0_79], %227 {strides = array<i32>} : memref<8x8x128xf32, #tpu.memory_space<vmem>>, vector<1x8x128xf32>,
    %228 = vector.extract_strided_slice %9 {offsets = [56, 0], sizes = [8, 384], strides = [1, 1]} : vector<64x384xf32> to vector<8x384xf32>
    %c0_80 = arith.constant 0 : index
    %c0_81 = arith.constant 0 : index
    %229 = vector.load %arg4[%c0_80, %c0_81] : memref<128x256xf32, #tpu.memory_space<vmem>>, vector<128x256xf32>
    %cst_82 = arith.constant dense<0.000000e+00> : vector<8x256xf32>
    %230 = tpu.matmul %224, %229, %cst_82 {dimension_numbers = #tpu.dot_dimension_numbers<[1], [0], [0], [1], [0, 0, 1, 1], [], []>} : vector<8x128xf32>, vector<128x256xf32>, vector<8x256xf32> -> vector<8x256xf32>
    %231 = vector.extract_strided_slice %228 {offsets = [0, 0], sizes = [8, 128], strides = [1, 1]} : vector<8x384xf32> to vector<8x128xf32>
    %232 = vector.extract_strided_slice %230 {offsets = [0, 0], sizes = [8, 128], strides = [1, 1]} : vector<8x256xf32> to vector<8x128xf32>
    %233 = arith.addf %231, %232 : vector<8x128xf32>
    %234 = arith.negf %233 : vector<8x128xf32>
    %235 = math.exp %234 : vector<8x128xf32>
    %cst_83 = arith.constant 1.000000e+00 : f32
    %236 = vector.broadcast %cst_83 : f32 to vector<8x128xf32>
    %237 = arith.addf %236, %235 : vector<8x128xf32>
    %238 = arith.divf %236, %237 : vector<8x128xf32>
    %239 = vector.extract_strided_slice %228 {offsets = [0, 128], sizes = [8, 128], strides = [1, 1]} : vector<8x384xf32> to vector<8x128xf32>
    %240 = vector.extract_strided_slice %230 {offsets = [0, 128], sizes = [8, 128], strides = [1, 1]} : vector<8x256xf32> to vector<8x128xf32>
    %241 = arith.addf %239, %240 : vector<8x128xf32>
    %242 = arith.negf %241 : vector<8x128xf32>
    %243 = math.exp %242 : vector<8x128xf32>
    %cst_84 = arith.constant 1.000000e+00 : f32
    %244 = vector.broadcast %cst_84 : f32 to vector<8x128xf32>
    %245 = arith.addf %244, %243 : vector<8x128xf32>
    %246 = arith.divf %244, %245 : vector<8x128xf32>
    %247 = vector.extract_strided_slice %228 {offsets = [0, 256], sizes = [8, 128], strides = [1, 1]} : vector<8x384xf32> to vector<8x128xf32>
    %248 = arith.mulf %246, %224 : vector<8x128xf32>
    %c0_85 = arith.constant 0 : index
    %c0_86 = arith.constant 0 : index
    %249 = vector.load %arg5[%c0_85, %c0_86] : memref<128x128xf32, #tpu.memory_space<vmem>>, vector<128x128xf32>
    %cst_87 = arith.constant dense<0.000000e+00> : vector<8x128xf32>
    %250 = tpu.matmul %248, %249, %cst_87 {dimension_numbers = #tpu.dot_dimension_numbers<[1], [0], [0], [1], [0, 0, 1, 1], [], []>} : vector<8x128xf32>, vector<128x128xf32>, vector<8x128xf32> -> vector<8x128xf32>
    %251 = arith.addf %247, %250 : vector<8x128xf32>
    %252 = math.tanh %251 : vector<8x128xf32>
    %253 = arith.subf %224, %252 : vector<8x128xf32>
    %254 = arith.mulf %238, %253 : vector<8x128xf32>
    %255 = arith.addf %252, %254 : vector<8x128xf32>
    %c7 = arith.constant 7 : index
    %c0_88 = arith.constant 0 : index
    %c0_89 = arith.constant 0 : index
    %256 = vector.load %arg7[%c7, %c0_88, %c0_89] : memref<8x8x128xf32, #tpu.memory_space<vmem>>, vector<1x8x128xf32>
    %257 = vector.shape_cast %256 : vector<1x8x128xf32> to vector<8x128xf32>
    %258 = vector.shape_cast %255 : vector<8x128xf32> to vector<1x8x128xf32>
    tpu.vector_store %arg7[%c7, %c0_88, %c0_89], %258 {strides = array<i32>} : memref<8x8x128xf32, #tpu.memory_space<vmem>>, vector<1x8x128xf32>,
    %c0_90 = arith.constant 0 : index
    %c0_91 = arith.constant 0 : index
    %259 = vector.load %arg8[%c0_90, %c0_91] : memref<8x128xf32, #tpu.memory_space<vmem>>, vector<8x128xf32>
    tpu.vector_store %arg8[%c0_90, %c0_91], %255 {strides = array<i32>} : memref<8x128xf32, #tpu.memory_space<vmem>>, vector<8x128xf32>,
    return
  }
  func.func @transform_0(%arg0: i32) -> (i32, i32, i32) {
    %c0_i32 = arith.constant 0 : i32
    %c0_i32_0 = arith.constant 0 : i32
    %c0_i32_1 = arith.constant 0 : i32
    return %arg0, %c0_i32, %c0_i32_0 : i32, i32, i32
  }
  func.func @transform_1(%arg0: i32) -> (i32, i32) {
    %c0_i32 = arith.constant 0 : i32
    %c0_i32_0 = arith.constant 0 : i32
    %c0_i32_1 = arith.constant 0 : i32
    return %c0_i32, %c0_i32_0 : i32, i32
  }
  func.func @transform_2(%arg0: i32) -> (i32, i32) {
    %c0_i32 = arith.constant 0 : i32
    %c0_i32_0 = arith.constant 0 : i32
    %c0_i32_1 = arith.constant 0 : i32
    return %c0_i32, %c0_i32_0 : i32, i32
  }
  func.func @transform_3(%arg0: i32) -> (i32, i32) {
    %c0_i32 = arith.constant 0 : i32
    %c0_i32_0 = arith.constant 0 : i32
    %c0_i32_1 = arith.constant 0 : i32
    return %c0_i32, %c0_i32_0 : i32, i32
  }
  func.func @transform_4(%arg0: i32) -> (i32, i32) {
    %c0_i32 = arith.constant 0 : i32
    %c0_i32_0 = arith.constant 0 : i32
    %c0_i32_1 = arith.constant 0 : i32
    return %c0_i32, %c0_i32_0 : i32, i32
  }
  func.func @transform_5(%arg0: i32) -> (i32, i32) {
    %c0_i32 = arith.constant 0 : i32
    %c0_i32_0 = arith.constant 0 : i32
    %c0_i32_1 = arith.constant 0 : i32
    return %c0_i32, %c0_i32_0 : i32, i32
  }
  func.func @transform_6(%arg0: i32) -> (i32, i32, i32) {
    %c0_i32 = arith.constant 0 : i32
    %c0_i32_0 = arith.constant 0 : i32
    %c0_i32_1 = arith.constant 0 : i32
    return %arg0, %c0_i32, %c0_i32_0 : i32, i32, i32
  }
}

</mosaic_0001>

<bundles_post_ra>
// kernel: tpu_custom_call.1
= control target key start
LH: loop header
LB: loop body
LE: loop exit
PB: predicated region body
PF: predicated region fallthrough
CT: control target
= control target key end

     0   :  { %11 = vsyncpa [#allocation4], 0  ;;  %s3874_s0 = inlined_call_operand.hbm [shape: f32[8,8,16], index: 0, kind: input, shape index: {}]   ;;  %s3875_s1 = inlined_call_operand.hbm [shape: f32[8,128], index: 1, kind: input, shape index: {}]   ;;  %s3876_s2 = inlined_call_operand.hbm [shape: f32[16,384], index: 2, kind: input, shape index: {}]   ;;  %s3877_s3 = inlined_call_operand.hbm [shape: f32[128,256], index: 3, kind: input, shape index: {}]   ;;  %s3878_s4 = inlined_call_operand.hbm [shape: f32[128,128], index: 4, kind: input, shape index: {}]   ;;  %s3879_s5 = inlined_call_operand.vmem [shape: f32[1,384], index: 5, kind: input, shape index: {}]   ;;  %s3880_s6 = inlined_call_operand.hbm [shape: f32[8,8,128], index: 6, kind: output, shape index: {}]  }
   0x1   :  { %12 = vsyncpa [#allocation7], 0 }
   0x2   :  { %13 = vsyncpa [#allocation10], 0 }
   0x3   :  { %14 = vsyncpa [#allocation5], 0  ;;  %s3275_s21 = smov [#allocation6]   ;;  %s3276_s23 = smov [#allocation9]  }
   0x4   :  { %s33_s22 = sshll.u32 %s3275_s21, 4  ;;  %s54_s24 = sshll.u32 %s3276_s23, 4  ;;  %s34_s22 = int_to_ptr.vmem [resolvable:$true] %s33_s22  ;;  %s3325_s24 = int_to_ptr.vmem [resolvable:$true] %s54_s24 }
   0x5   :  { %s3135_s27 = scalar_lea.hbm %s3875_s1, 128 }
   0x6   :  { %p3136_p0 = scmp.ne.s32.totalorder %s3875_s1, %s3135_s27  ;;  %p3139_p1 = scmp.lt.u32.totalorder %s3135_s27, %s3875_s1 }
   0x8   :  { %p3141_p2 = pnand %p3139_p1, %p3136_p0 }
   0xa   :  { %3144 = shalt.err (!%p3141_p2)
}
   0xb   :  { %s3145_s8 = scalar_lea.vmem %s34_s22, 128  ;;  %p3150_p4 = scmp.lt.s32.totalorder %s34_s22, %s34_s22 }
   0xc   :  { %p3146_p3 = scmp.ne.s32.totalorder %s34_s22, %s3145_s8  ;;  %p3151_p5 = scmp.lt.s32.totalorder %s3145_s8, %s3145_s8 }
   0xe   :  { %p3152_p6 = por %p3151_p5, %p3150_p4 }
  0x10   :  { %p3153_p7 = pnand %p3152_p6, %p3146_p3 }
  0x12   :  { %3156 = shalt.err (!%p3153_p7)
}
  0x13   :  { %36 = dma.hbm_to_vmem [thread:$0]  %s3875_s1, 128, %s34_s22, [#allocation7]  }
  0x14   :  { %s3157_s13 = scalar_lea.hbm %s3877_s3, 4096 }
  0x15   :  { %p3158_p8 = scmp.ne.s32.totalorder %s3877_s3, %s3157_s13  ;;  %p3161_p9 = scmp.lt.u32.totalorder %s3157_s13, %s3877_s3 }
  0x17   :  { %p3163_p10 = pnand %p3161_p9, %p3158_p8 }
  0x19   :  { %3166 = shalt.err (!%p3163_p10)
}
  0x1a   :  { %s3167_s18 = scalar_lea.vmem %s3325_s24, 4096  ;;  %p3172_p12 = scmp.lt.s32.totalorder %s3325_s24, %s3325_s24 }
  0x1b   :  { %p3168_p11 = scmp.ne.s32.totalorder %s3325_s24, %s3167_s18  ;;  %p3173_p13 = scmp.lt.s32.totalorder %s3167_s18, %s3167_s18 }
  0x1d   :  { %p3174_p0 = por %p3173_p13, %p3172_p12 }
  0x1f   :  { %p3175_p1 = pnand %p3174_p0, %p3168_p11 }
  0x21   :  { %3178 = shalt.err (!%p3175_p1)
}
  0x22   :  { %s3277_s1 = smov 256   ;;  %s3278_s19 = smov 16  }
  0x23   :  { %60 = dma.hbm_to_vmem [thread:$0]  %s3877_s3, 4096, %s3325_s24, [#allocation10], %s3277_s1, %s3277_s1, %s3278_s19  }
  0x24   :  { %s3279_s22 = smov [#allocation3]   ;;  %s3179_s27 = scalar_lea.hbm %s3874_s0, 1024 }
  0x25   :  { %s20_s23 = sshll.u32 %s3279_s22, 4  ;;  %p3180_p2 = scmp.ne.s32.totalorder %s3874_s0, %s3179_s27  ;;  %s21_s23 = int_to_ptr.vmem [resolvable:$true] %s20_s23 }
  0x26   :  { %p3183_p3 = scmp.lt.u32.totalorder %s3179_s27, %s3874_s0 }
  0x28   :  { %p3185_p4 = pnand %p3183_p3, %p3180_p2 }
  0x2a   :  { %3188 = shalt.err (!%p3185_p4)
}
  0x2b   :  { %s3189_s8 = scalar_lea.vmem %s21_s23, 1024  ;;  %p3194_p6 = scmp.lt.s32.totalorder %s21_s23, %s21_s23 }
  0x2c   :  { %p3190_p5 = scmp.ne.s32.totalorder %s21_s23, %s3189_s8  ;;  %p3195_p7 = scmp.lt.s32.totalorder %s3189_s8, %s3189_s8 }
  0x2e   :  { %p3196_p8 = por %p3195_p7, %p3194_p6 }
  0x30   :  { %p3197_p9 = pnand %p3196_p8, %p3190_p5 }
  0x32   :  { %3200 = shalt.err (!%p3197_p9)
}
  0x33   :  { %s3280_s3 = smov 128   ;;  %s3281_s24 = smov 8  }
  0x34   :  { %26 = dma.hbm_to_vmem [thread:$0]  %s3874_s0, 1024, %s21_s23, [#allocation4], %s3280_s3, %s3280_s3, %s3281_s24  }
  0x35   :  { %s3282_s11 = smov [#allocation8]   ;;  %s3201_s15 = scalar_lea.hbm %s3876_s2, 768 }
  0x36   :  { %s42_s12 = sshll.u32 %s3282_s11, 4  ;;  %p3202_p10 = scmp.ne.s32.totalorder %s3876_s2, %s3201_s15  ;;  %s43_s12 = int_to_ptr.vmem [resolvable:$true] %s42_s12 }
  0x37   :  { %p3205_p11 = scmp.lt.u32.totalorder %s3201_s15, %s3876_s2 }
  0x39   :  { %p3207_p12 = pnand %p3205_p11, %p3202_p10 }
  0x3b   :  { %3210 = shalt.err (!%p3207_p12)
}
  0x3c   :  { %s3211_s19 = scalar_lea.vmem %s43_s12, 768  ;;  %p3216_p0 = scmp.lt.s32.totalorder %s43_s12, %s43_s12 }
  0x3d   :  { %p3212_p13 = scmp.ne.s32.totalorder %s43_s12, %s3211_s19  ;;  %p3217_p1 = scmp.lt.s32.totalorder %s3211_s19, %s3211_s19 }
  0x3f   :  { %p3218_p2 = por %p3217_p1, %p3216_p0 }
  0x41   :  { %p3219_p3 = pnand %p3218_p2, %p3212_p13 }
  0x43   :  { %3222 = shalt.err (!%p3219_p3)
}
  0x44   :  { %s3283_s0 = smov 384   ;;  %s3284_s20 = smov 24  }
  0x45   :  { %48 = dma.hbm_to_vmem [thread:$0]  %s3876_s2, 768, %s43_s12, [#allocation7], %s3283_s0, %s3283_s0, %s3284_s20  }
  0x46   :  { %s3285_s23 = smov [#allocation11]   ;;  %s3223_s28 = scalar_lea.hbm %s3878_s4, 2048 }
  0x47   :  { %s66_s25 = sshll.u32 %s3285_s23, 4  ;;  %p3224_p4 = scmp.ne.s32.totalorder %s3878_s4, %s3223_s28  ;;  %s67_s25 = int_to_ptr.vmem [resolvable:$true] %s66_s25 }
  0x48   :  { %p3227_p5 = scmp.lt.u32.totalorder %s3223_s28, %s3878_s4 }
  0x4a   :  { %p3229_p6 = pnand %p3227_p5, %p3224_p4 }
  0x4c   :  { %3232 = shalt.err (!%p3229_p6)
}
  0x4d   :  { %s3233_s9 = scalar_lea.vmem %s67_s25, 2048  ;;  %p3238_p8 = scmp.lt.s32.totalorder %s67_s25, %s67_s25 }
  0x4e   :  { %p3234_p7 = scmp.ne.s32.totalorder %s67_s25, %s3233_s9  ;;  %p3239_p9 = scmp.lt.s32.totalorder %s3233_s9, %s3233_s9 }
  0x50   :  { %p3240_p10 = por %p3239_p9, %p3238_p8 }
  0x52   :  { %p3241_p11 = pnand %p3240_p10, %p3234_p7 }
  0x54   :  { %3244 = shalt.err (!%p3241_p11)
}
  0x55   :  { %72 = dma.hbm_to_vmem [thread:$0]  %s3878_s4, 2048, %s67_s25, [#allocation10], %s3280_s3, %s3280_s3, %s3281_s24  }
  0x56   :  { %3267 = dma.done.wait [#allocation4], 1024  }
  0x57   :  { %3268 = vsyncadd [#allocation4], 4294966272 }
  0x58   :  { %3269 = dma.done.wait [#allocation7], 896  }
  0x59   :  { %3270 = vsyncadd [#allocation7], 4294966400 }
  0x5a   :  { %3271 = dma.done.wait [#allocation10], 6144  }
  0x5b   :  { %3272 = vsyncadd [#allocation10], 4294961152  ;;  %v3286_v0 = vmov 0.0   ;;  %v105_v1 = vld [vmem:[#allocation8 + $0x8] sm:$0xff]  ;;  %v108_v2 = vld [vmem:[#allocation8 + $0x20] sm:$0xff]  ;;  %vm127_vm0 = vcmask 130048  }
  0x5c   :  { %216 = vmatprep.mubr.f32.mxu0 %v3286_v0  ;;  %v104_v3 = vld [vmem:[#allocation8] sm:$0xff]  ;;  %v2552_v4 = vpack.c.bf16 %v108_v2, %v105_v1  ;;  %v107_v5 = vld [vmem:[#allocation8 + $0x18] sm:$0xff]  ;;  %v374_v9 = vld [vmem:[#allocation9 + $0x18] sm:$0xff]  ;;  %vm3288_vm1 = vmmov 0  }
  0x5d   :  { %v96_v6 = vld [vmem:[#allocation3] sm:$0xff]  ;;  %v2554_v8 = vpack.c.bf16 %v107_v5, %v104_v3  ;;  %v371_v10 = vld [vmem:[#allocation9] sm:$0xff]  ;;  %v373_v11 = vld [vmem:[#allocation9 + $0x10] sm:$0xff] }
  0x5e   :  { %v372_v7 = vld [vmem:[#allocation9 + $0x8] sm:$0xff]  ;;  %2260 = vmatprep.mubr.msk.f32.mxu1 %vm127_vm0, %v96_v6  ;;  %2553 = vmatprep.subr.bf16.mxu0 %v2552_v4  ;;  %v378_v14 = vld [vmem:[#allocation9 + $0x38] sm:$0xff]  ;;  %v3402_v15 = vpack.c.bf16 %v373_v11, %v371_v10  ;;  %v375_v17 = vld [vmem:[#allocation9 + $0x20] sm:$0xff] }
  0x5f   :  { %v3400_v12 = vpack.c.bf16 %v374_v9, %v372_v7  ;;  %v376_v13 = vld [vmem:[#allocation9 + $0x28] sm:$0xff]  ;;  %2555 = vmatpush1.bf16.msra.mxu0 %v2554_v8  ;;  %v377_v18 = vld [vmem:[#allocation9 + $0x30] sm:$0xff]  ;;  %v382_v20 = vld [vmem:[#allocation9 + $0x58] sm:$0xff]  ;;  %v3287_v7 = vmov 0.0|0.0  }
  0x60   :  { %v3405_v16 = vpack.c.bf16 %v378_v14, %v376_v13  ;;  %v380_v19 = vld [vmem:[#allocation9 + $0x48] sm:$0xff]  ;;  %v97_v21 = vld [vmem:[#allocation3 + $0x8] sm:$0xff]  ;;  %v3410_v22 = vpack.c.bf16 %v377_v18, %v375_v17  ;;  %v379_v24 = vld [vmem:[#allocation9 + $0x40] sm:$0xff] }
  0x61   :  { %2561 = vmatprep.subr.bf16.mxu0 %v3400_v12  ;;  %v3413_v23 = vpack.c.bf16 %v382_v20, %v380_v19  ;;  %v381_v25 = vld [vmem:[#allocation9 + $0x50] sm:$0xff]  ;;  %v384_v26 = vld [vmem:[#allocation9 + $0x68] sm:$0xff]  ;;  %v386_v27 = vld [vmem:[#allocation9 + $0x78] sm:$0xff] }
  0x62   :  { %2078 = vmatmul.mubr.msk.f32.vlgmr.msra.gmra.mrb[0].mxu0 %vm127_vm0, %v96_v6  ;;  %v98_v28 = vld [vmem:[#allocation3 + $0x10] sm:$0xff]  ;;  %v3418_v29 = vpack.c.bf16 %v381_v25, %v379_v24  ;;  %v3421_v30 = vpack.c.bf16 %v386_v27, %v384_v26  ;;  %v383_v31 = vld [vmem:[#allocation9 + $0x60] sm:$0xff]  ;;  %v385_v32 = vld [vmem:[#allocation9 + $0x70] sm:$0xff] }
  0x63   :  { %2563 = vmatpush1.bf16.msra.mxu0 %v3402_v15  ;;  %222 = vmatprep.mubr.f32.mxu0 %v3286_v0  ;;  %v388_v33 = vld [vmem:[#allocation9 + $0x88] sm:$0xff]  ;;  %v390_v34 = vld [vmem:[#allocation9 + $0x98] sm:$0xff]  ;;  %v106_v35 = vld [vmem:[#allocation8 + $0x10] sm:$0xff]  ;;  %v3426_v38 = vpack.c.bf16 %v385_v32, %v383_v31 }
  0x64   :  { %2565 = vmatprep.subr.bf16.mxu0 %v3405_v16  ;;  %v109_v36 = vld [vmem:[#allocation8 + $0x28] sm:$0xff]  ;;  %v99_v37 = vld [vmem:[#allocation3 + $0x18] sm:$0xff]  ;;  %v3429_v40 = vpack.c.bf16 %v390_v34, %v388_v33  ;;  %v389_v42 = vld [vmem:[#allocation9 + $0x90] sm:$0xff] }
  0x65   :  { %v2556_v39 = vpack.c.bf16 %v109_v36, %v106_v35  ;;  %v387_v41 = vld [vmem:[#allocation9 + $0x80] sm:$0xff]  ;;  %v392_v43 = vld [vmem:[#allocation9 + $0xa8] sm:$0xff]  ;;  %v394_v44 = vld [vmem:[#allocation9 + $0xb8] sm:$0xff]  ;;  %v112_v36 = vlaneseq }
  0x66   :  { %2079 = vmatmul.mubr.msk.f32.gmra.mrb[2].mxu0 %vm127_vm0, %v97_v21  ;;  %v100_v45 = vld [vmem:[#allocation3 + $0x20] sm:$0xff]  ;;  %v3434_v46 = vpack.c.bf16 %v389_v42, %v387_v41  ;;  %v3437_v47 = vpack.c.bf16 %v394_v44, %v392_v43  ;;  %v391_v48 = vld [vmem:[#allocation9 + $0xa0] sm:$0xff]  ;;  %v393_v49 = vld [vmem:[#allocation9 + $0xb0] sm:$0xff] }
  0x67   :  { %2567 = vmatpush1.bf16.msra.mxu0 %v3410_v22  ;;  %228 = vmatprep.mubr.f32.mxu0 %v3286_v0  ;;  %v396_v50 = vld [vmem:[#allocation9 + $0xc8] sm:$0xff]  ;;  %v398_v51 = vld [vmem:[#allocation9 + $0xd8] sm:$0xff]  ;;  %v101_v52 = vld [vmem:[#allocation3 + $0x28] sm:$0xff]  ;;  %v3444_v53 = vpack.c.bf16 %v393_v49, %v391_v48 }
  0x68   :  { %2569 = vmatprep.subr.bf16.mxu0 %v3413_v23  ;;  %2557 = vmatprep.subr.bf16.mxu1 %v2556_v39  ;;  %v3447_v54 = vpack.c.bf16 %v398_v51, %v396_v50  ;;  %v395_v55 = vld [vmem:[#allocation9 + $0xc0] sm:$0xff]  ;;  %v397_v56 = vld [vmem:[#allocation9 + $0xd0] sm:$0xff]  ;;  %v400_v57 = vld [vmem:[#allocation9 + $0xe8] sm:$0xff] }
  0x69   :  { %2559 = vmatpush3.bf16.msra.mxu1 %v2556_v39  ;;  %v402_v58 = vld [vmem:[#allocation9 + $0xf8] sm:$0xff]  ;;  %v3454_v60 = vpack.c.bf16 %v397_v56, %v395_v55  ;;  %v399_v62 = vld [vmem:[#allocation9 + $0xe0] sm:$0xff]  ;;  %v401_v63 = vld [vmem:[#allocation9 + $0xf0] sm:$0xff] }
  0x6a   :  { %2080 = vmatmul.mubr.msk.f32.gmra.mrb[4].mxu0 %vm127_vm0, %v98_v28  ;;  %v102_v59 = vld [vmem:[#allocation3 + $0x30] sm:$0xff]  ;;  %v3457_v61 = vpack.c.bf16 %v402_v58, %v400_v57  ;;  %v103_v1 = vld [vmem:[#allocation3 + $0x38] sm:$0xff]  ;;  %v3464_v2 = vpack.c.bf16 %v401_v63, %v399_v62  ;;  %v3471_v3 = vld [vmem:[#allocation6] sm:$0xff]  ;;  %2592 = vmatprep.subr.bf16.mxu1 %v3287_v7 }
  0x6b   :  { %2571 = vmatpush1.bf16.msra.mxu0 %v3418_v29  ;;  %234 = vmatprep.mubr.f32.mxu0 %v3286_v0  ;;  %v489_v4 = vld [vmem:[#allocation11] sm:$0xff]  ;;  %v490_v5 = vld [vmem:[#allocation11 + $0x8] sm:$0xff]  ;;  %v491_v8 = vld [vmem:[#allocation11 + $0x10] sm:$0xff] }
  0x6c   :  { %2573 = vmatprep.subr.bf16.mxu0 %v3421_v30  ;;  %2261 = vmatmul.mubr.msk.f32.vlgmr.msra.gmra.mrb[0].mxu1 %vm127_vm0, %v97_v21  ;;  %v3492_v6 = vpack.c.bf16 %v490_v5, %v489_v4  ;;  %v492_v9 = vld [vmem:[#allocation11 + $0x18] sm:$0xff]  ;;  %v493_v11 = vld [vmem:[#allocation11 + $0x20] sm:$0xff]  ;;  %v494_v13 = vld [vmem:[#allocation11 + $0x28] sm:$0xff] }
  0x6d   :  { %2263 = vmatprep.mubr.msk.f32.mxu1 %vm127_vm0, %v98_v28  ;;  %v3497_v10 = vpack.c.bf16 %v492_v9, %v491_v8  ;;  %v3501_v14 = vpack.c.bf16 %v494_v13, %v493_v11  ;;  %v495_v17 = vld [vmem:[#allocation11 + $0x30] sm:$0xff]  ;;  %v496_v18 = vld [vmem:[#allocation11 + $0x38] sm:$0xff]  ;;  %v497_v20 = vld [vmem:[#allocation11 + $0x40] sm:$0xff] }
  0x6e   :  { %2081 = vmatmul.mubr.msk.f32.gmra.mrb[6].mxu0 %vm127_vm0, %v99_v37  ;;  %2594 = vmatpush3.bf16.msra.mxu1 %v3492_v6  ;;  %v3505_v19 = vpack.c.bf16 %v496_v18, %v495_v17  ;;  %v498_v21 = vld [vmem:[#allocation11 + $0x48] sm:$0xff]  ;;  %v499_v25 = vld [vmem:[#allocation11 + $0x50] sm:$0xff]  ;;  %v500_v26 = vld [vmem:[#allocation11 + $0x58] sm:$0xff] }
  0x6f   :  { %2575 = vmatpush1.bf16.msra.mxu0 %v3426_v38  ;;  %240 = vmatprep.mubr.f32.mxu0 %v3286_v0  ;;  %v3509_v24 = vpack.c.bf16 %v498_v21, %v497_v20  ;;  %v3513_v27 = vpack.c.bf16 %v500_v26, %v499_v25  ;;  %v501_v28 = vld [vmem:[#allocation11 + $0x60] sm:$0xff]  ;;  %v502_v31 = vld [vmem:[#allocation11 + $0x68] sm:$0xff]  ;;  %v503_v33 = vld [vmem:[#allocation11 + $0x70] sm:$0xff] }
  0x70   :  { %2577 = vmatprep.subr.bf16.mxu0 %v3429_v40  ;;  %2264 = vmatmul.mubr.msk.f32.gmra.mrb[2].mxu1 %vm127_vm0, %v99_v37  ;;  %v3518_v32 = vpack.c.bf16 %v502_v31, %v501_v28  ;;  %v504_v34 = vld [vmem:[#allocation11 + $0x78] sm:$0xff]  ;;  %v113_v37 = vshrl.u32 %v112_v36, 7  ;;  %v110_v41 = vld [vmem:[%s3879_s5] sm:$0x7]  ;;  %s3289_s5 = smov [#allocation12]  }
  0x71   :  { %2266 = vmatprep.mubr.msk.f32.mxu1 %vm127_vm0, %v100_v45  ;;  %2595 = vmatprep.subr.bf16.mxu1 %v3287_v7  ;;  %v3522_v35 = vpack.c.bf16 %v504_v34, %v503_v33  ;;  %s2064_s12 = sshll.u32 %s3289_s5, 4  ;;  %s2065_s12 = int_to_ptr.vmem [resolvable:$true] %s2064_s12 }
  0x72   :  { %2082 = vmatmul.mubr.msk.f32.gmra.mrb[8].mxu0 %vm127_vm0, %v100_v45  ;;  %2597 = vmatpush3.bf16.msra.mxu1 %v3497_v10  ;;  %v122_v39 = vsub.s32 2, %v113_v37  ;;  %v118_v58 = vsub.s32 1, %v113_v37  ;;  %v114_v21 = vsub.s32 0, %v113_v37  ;;  %s3245_s13 = scalar_lea.vmem %s2065_s12, 1024  ;;  %p3250_p13 = scmp.lt.s32.totalorder %s2065_s12, %s2065_s12 }
  0x73   :  { %2579 = vmatpush1.bf16.msra.mxu0 %v3434_v46  ;;  %246 = vmatprep.mubr.f32.mxu0 %v3286_v0  ;;  %p3246_p12 = scmp.ne.s32.totalorder %s2065_s12, %s3245_s13  ;;  %p3251_p0 = scmp.lt.s32.totalorder %s3245_s13, %s3245_s13 }
  0x74   :  { %2581 = vmatprep.subr.bf16.mxu0 %v3437_v47  ;;  %2267 = vmatmul.mubr.msk.f32.gmra.mrb[4].mxu1 %vm127_vm0, %v101_v52  ;;  %v123_v42 = vrot.slane %v110_v41, %v122_v39  ;;  %v3544_v4 = vrot.slane %v110_v41, %v118_v58  ;;  %v3566_v25 = vrot.slane %v110_v41, %v114_v21 }
  0x75   :  { %2269 = vmatprep.mubr.msk.f32.mxu1 %vm127_vm0, %v102_v59  ;;  %2598 = vmatprep.subr.bf16.mxu1 %v3287_v7  ;;  %p3252_p1 = por %p3251_p0, %p3250_p13 }
  0x76   :  { %2083 = vmatmul.mubr.msk.f32.gmra.mrb[10].mxu0 %vm127_vm0, %v101_v52  ;;  %2600 = vmatpush3.bf16.msra.mxu1 %v3501_v14 }
  0x77   :  { %2583 = vmatpush1.bf16.msra.mxu0 %v3444_v53  ;;  %252 = vmatprep.mubr.f32.mxu0 %v3286_v0  ;;  %p3253_p2 = pnand %p3252_p1, %p3246_p12 }
  0x78   :  { %2585 = vmatprep.subr.bf16.mxu0 %v3447_v54  ;;  %2270 = vmatmul.mubr.msk.f32.gmra.mrb[6].mxu1 %vm127_vm0, %v103_v1 }
  0x79   :  { %2601 = vmatprep.subr.bf16.mxu1 %v3287_v7  ;;  %2304 = vmatprep.mubr.msk.f32.mxu1 %vm3288_vm1, %v3286_v0 }
  0x7a   :  { %2084 = vmatmul.mubr.msk.f32.gmra.mrb[12].mxu0 %vm127_vm0, %v102_v59  ;;  %2603 = vmatpush3.bf16.msra.mxu1 %v3505_v19 }
  0x7b   :  { %2587 = vmatpush1.bf16.msra.mxu0 %v3454_v60  ;;  %258 = vmatprep.mubr.f32.mxu0 %v3286_v0 }
  0x7c   :  { %2589 = vmatprep.subr.bf16.mxu0 %v3457_v61  ;;  %2604 = vmatprep.subr.bf16.mxu1 %v3287_v7 }
  0x7e   :  { %2085 = vmatmul.mubr.msk.f32.gmra.mrb[14].mxu0 %vm127_vm0, %v103_v1  ;;  %2606 = vmatpush3.bf16.msra.mxu1 %v3509_v24 }
  0x7f   :  { %2591 = vmatpush1.bf16.msra.mxu0 %v3464_v2  ;;  %467 = vmatprep.mubr.f32.mxu0 %v3286_v0 }
  0x80   :  { %2617 = vmatprep.subr.bf16.mxu0 %v3400_v12  ;;  %2607 = vmatprep.subr.bf16.mxu1 %v3287_v7 }
  0x82   :  { %468 = vmatmul.mubr.f32.vlgmr.msra.gmra.mrb[0].mxu0 %v3471_v3  ;;  %2609 = vmatpush3.bf16.msra.mxu1 %v3513_v27 }
  0x83   :  { %2619 = vmatpush1.bf16.msra.mxu0 %v3402_v15  ;;  %677 = vmatprep.mubr.f32.mxu0 %v3286_v0 }
  0x84   :  { %2621 = vmatprep.subr.bf16.mxu0 %v3405_v16  ;;  %2610 = vmatprep.subr.bf16.mxu1 %v3287_v7 }
  0x86   :  { %2612 = vmatpush3.bf16.msra.mxu1 %v3518_v32 }
  0x87   :  { %2623 = vmatpush1.bf16.msra.mxu0 %v3410_v22  ;;  %2613 = vmatprep.subr.bf16.mxu1 %v3287_v7 }
  0x88   :  { %2625 = vmatprep.subr.bf16.mxu0 %v3413_v23 }
  0x8a   :  { %2615 = vmatpush3.bf16.msra.mxu1 %v3522_v35 }
  0x8b   :  { %2627 = vmatpush1.bf16.msra.mxu0 %v3418_v29  ;;  %2648 = vmatprep.subr.bf16.mxu1 %v3287_v7 }
  0x8c   :  { %2629 = vmatprep.subr.bf16.mxu0 %v3421_v30 }
  0x8f   :  { %2631 = vmatpush1.bf16.msra.mxu0 %v3426_v38 }
  0x90   :  { %2633 = vmatprep.subr.bf16.mxu0 %v3429_v40 }
  0x93   :  { %2635 = vmatpush1.bf16.msra.mxu0 %v3434_v46 }
  0x94   :  { %2637 = vmatprep.subr.bf16.mxu0 %v3437_v47 }
  0x97   :  { %2639 = vmatpush1.bf16.msra.mxu0 %v3444_v53 }
  0x98   :  { %2641 = vmatprep.subr.bf16.mxu0 %v3447_v54 }
  0x9b   :  { %2643 = vmatpush1.bf16.msra.mxu0 %v3454_v60 }
  0x9c   :  { %2645 = vmatprep.subr.bf16.mxu0 %v3457_v61 }
  0x9f   :  { %2647 = vmatpush1.bf16.msra.mxu0 %v3464_v2 }
  0xa0   :  { %2673 = vmatprep.subr.bf16.mxu0 %v3400_v12 }
 0x13f   :  { %v2262_v43 = vpop.f32.mrb[0].mxu1 }
 0x140   :  { %v3530_v44 = vadd.f32 %v2262_v43, %v123_v42  ;;  %v331_v45 = vpop.f32.mrb[1].mxu1 }
 0x141   :  { %v332_v33 = vadd.f32 %v331_v45, %v123_v42 }
 0x143   :  { %v2265_v48 = vpop.f32.mrb[2].mxu1 }
 0x144   :  { %v3532_v49 = vadd.f32 %v2265_v48, %v123_v42  ;;  %v341_v50 = vpop.f32.mrb[3].mxu1 }
 0x145   :  { %v3534_v51 = vadd.f32 %v341_v50, %v123_v42 }
 0x147   :  { %v2268_v52 = vpop.f32.mrb[4].mxu1 }
 0x148   :  { %v3536_v55 = vadd.f32 %v2268_v52, %v123_v42  ;;  %v351_v56 = vpop.f32.mrb[5].mxu1 }
 0x149   :  { %v3538_v57 = vadd.f32 %v351_v56, %v123_v42 }
 0x14b   :  { %v2271_v59 = vpop.f32.mrb[6].mxu1 }
 0x14c   :  { %v3540_v62 = vadd.f32 %v2271_v59, %v123_v42  ;;  %v361_v63 = vpop.f32.mrb[7].mxu1 }
 0x14d   :  { %v3542_v1 = vadd.f32 %v361_v63, %v123_v42 }
 0x155   :  { %v469_v5 = vpop.f32.mrb[0].mxu0 }
 0x156   :  { %v471_v8 = vpop.f32.mrb[1].mxu0  ;;  %v3008_v26 = vadd.f32 %v469_v5, %v3566_v25 }
 0x157   :  { %v3009_v9 = vadd.f32 %v471_v8, %v3544_v4 }
 0x158   :  { %v2094_v28 = vmul.f32 -1.442695, %v3008_v26 }
 0x159   :  { %v2095_v11 = vmul.f32 -1.442695, %v3009_v9 }
 0x15b   :  { %3055 = vpow2.f32 %v2095_v11 }
 0x165   :  { %v3056_v13 = vpop.eup %3055 }
 0x166   :  { %v485_v17 = vadd.f32 1.0, %v3056_v13 }
 0x168   :  { %3057 = vrcp.f32 %v485_v17 }
 0x169   :  { %3059 = vpow2.f32 %v2094_v28 }
 0x172   :  { %v3058_v18 = vpop.eup %3057 }
 0x173   :  { %v488_v20 = vmul.f32 %v3058_v18, %v3471_v3  ;;  %v3060_v31 = vpop.eup %3059 }
 0x174   :  { %v478_v36 = vadd.f32 1.0, %v3060_v31 }
 0x175   :  { %2305 = vmatmul.mubr.f32.vlgmr.msra.gmra.mrb[8].mxu1 %v488_v20 }
 0x176   :  { %2650 = vmatpush3.bf16.msra.mxu1 %v3492_v6  ;;  %2339 = vmatprep.mubr.msk.f32.mxu1 %vm3288_vm1, %v3286_v0 }
 0x177   :  { %2651 = vmatprep.subr.bf16.mxu1 %v3287_v7 }
 0x17a   :  { %2653 = vmatpush3.bf16.msra.mxu1 %v3497_v10 }
 0x17b   :  { %2654 = vmatprep.subr.bf16.mxu1 %v3287_v7 }
 0x17e   :  { %2656 = vmatpush3.bf16.msra.mxu1 %v3501_v14 }
 0x17f   :  { %2657 = vmatprep.subr.bf16.mxu1 %v3287_v7 }
 0x182   :  { %2659 = vmatpush3.bf16.msra.mxu1 %v3505_v19 }
 0x183   :  { %2660 = vmatprep.subr.bf16.mxu1 %v3287_v7 }
 0x186   :  { %2662 = vmatpush3.bf16.msra.mxu1 %v3509_v24 }
 0x187   :  { %2663 = vmatprep.subr.bf16.mxu1 %v3287_v7 }
 0x18a   :  { %2665 = vmatpush3.bf16.msra.mxu1 %v3513_v27 }
 0x18b   :  { %2666 = vmatprep.subr.bf16.mxu1 %v3287_v7 }
 0x18e   :  { %2668 = vmatpush3.bf16.msra.mxu1 %v3518_v32 }
 0x18f   :  { %2669 = vmatprep.subr.bf16.mxu1 %v3287_v7 }
 0x192   :  { %2671 = vmatpush3.bf16.msra.mxu1 %v3522_v35 }
 0x193   :  { %2704 = vmatprep.subr.bf16.mxu1 %v3287_v7 }
 0x248   :  { %v571_v34 = vpop.f32.mrb[8].mxu1 }
 0x249   :  { %v575_v39 = vadd.f32 %v571_v34, %v332_v33  ;;  %v2306_v43 = vpop.f32.mrb[9].mxu1  ;;  %v1219_v33 = vld [vmem:[#allocation9 + $0x28] sm:$0xff]  ;;  %v1221_v34 = vld [vmem:[#allocation9 + $0x38] sm:$0xff] }
 0x24a   :  { %v1218_v43 = vld [vmem:[#allocation9 + $0x20] sm:$0xff] }
 0x24b   :  { %3061 = vtanh.f32 %v575_v39  ;;  %v3654_v39 = vpack.c.bf16 %v1221_v34, %v1219_v33 }
 0x24c   :  { %3063 = vrcp.f32 %v478_v36 }
 0x255   :  { %v3062_v48 = vpop.eup %3061 }
 0x256   :  { %v577_v50 = vsub.f32 %v3471_v3, %v3062_v48  ;;  %v3064_v52 = vpop.eup %3063 }
 0x258   :  { %v578_v56 = vmul.f32 %v3064_v52, %v577_v50  ;;  %v1223_v50 = vld [vmem:[#allocation9 + $0x48] sm:$0xff]  ;;  %v1225_v52 = vld [vmem:[#allocation9 + $0x58] sm:$0xff] }
 0x25a   :  { %v579_v37 = vadd.f32 %v3062_v48, %v578_v56  ;;  %v1220_v48 = vld [vmem:[#allocation9 + $0x30] sm:$0xff] }
 0x25b   :  { %v3658_v56 = vpack.c.bf16 %v1220_v48, %v1218_v43 }
 0x25c   :  { %580 = vst [vmem:[#allocation12] sm:$0xff] %v579_v37  ;;  %678 = vmatmul.mubr.f32.vlgmr.msra.gmra.mrb[2].mxu0 %v579_v37 }
 0x25d   :  { %2675 = vmatpush1.bf16.msra.mxu0 %v3402_v15  ;;  %888 = vmatprep.mubr.f32.mxu0 %v3286_v0 }
 0x25e   :  { %2677 = vmatprep.subr.bf16.mxu0 %v3405_v16 }
 0x261   :  { %2679 = vmatpush1.bf16.msra.mxu0 %v3410_v22 }
 0x262   :  { %2681 = vmatprep.subr.bf16.mxu0 %v3413_v23 }
 0x265   :  { %2683 = vmatpush1.bf16.msra.mxu0 %v3418_v29 }
 0x266   :  { %2685 = vmatprep.subr.bf16.mxu0 %v3421_v30 }
 0x269   :  { %2687 = vmatpush1.bf16.msra.mxu0 %v3426_v38 }
 0x26a   :  { %2689 = vmatprep.subr.bf16.mxu0 %v3429_v40 }
 0x26d   :  { %2691 = vmatpush1.bf16.msra.mxu0 %v3434_v46 }
 0x26e   :  { %2693 = vmatprep.subr.bf16.mxu0 %v3437_v47 }
 0x271   :  { %2695 = vmatpush1.bf16.msra.mxu0 %v3444_v53 }
 0x272   :  { %2697 = vmatprep.subr.bf16.mxu0 %v3447_v54 }
 0x275   :  { %2699 = vmatpush1.bf16.msra.mxu0 %v3454_v60 }
 0x276   :  { %2701 = vmatprep.subr.bf16.mxu0 %v3457_v61 }
 0x279   :  { %2703 = vmatpush1.bf16.msra.mxu0 %v3464_v2 }
 0x27a   :  { %2729 = vmatprep.subr.bf16.mxu0 %v3400_v12 }
 0x32f   :  { %v679_v3 = vpop.f32.mrb[2].mxu0 }
 0x330   :  { %v681_v41 = vpop.f32.mrb[3].mxu0  ;;  %v3010_v12 = vadd.f32 %v679_v3, %v3566_v25  ;;  %v1222_v3 = vld [vmem:[#allocation9 + $0x40] sm:$0xff] }
 0x331   :  { %v3011_v42 = vadd.f32 %v681_v41, %v3544_v4  ;;  %v1224_v41 = vld [vmem:[#allocation9 + $0x50] sm:$0xff] }
 0x332   :  { %v2096_v8 = vmul.f32 -1.442695, %v3010_v12 }
 0x333   :  { %v2097_v45 = vmul.f32 -1.442695, %v3011_v42  ;;  %v3664_v42 = vpack.c.bf16 %v1224_v41, %v1222_v3 }
 0x335   :  { %3065 = vpow2.f32 %v2097_v45 }
 0x33f   :  { %v3066_v58 = vpop.eup %3065 }
 0x340   :  { %v695_v59 = vadd.f32 1.0, %v3066_v58 }
 0x342   :  { %3067 = vrcp.f32 %v695_v59 }
 0x343   :  { %3069 = vpow2.f32 %v2096_v8 }
 0x34c   :  { %v3068_v63 = vpop.eup %3067 }
 0x34d   :  { %v698_v5 = vmul.f32 %v3068_v63, %v579_v37  ;;  %v3070_v9 = vpop.eup %3069 }
 0x34e   :  { %v688_v13 = vadd.f32 1.0, %v3070_v9 }
 0x34f   :  { %2340 = vmatmul.mubr.f32.vlgmr.msra.gmra.mrb[10].mxu1 %v698_v5 }
 0x350   :  { %2706 = vmatpush3.bf16.msra.mxu1 %v3492_v6  ;;  %2374 = vmatprep.mubr.msk.f32.mxu1 %vm3288_vm1, %v3286_v0 }
 0x351   :  { %2707 = vmatprep.subr.bf16.mxu1 %v3287_v7 }
 0x354   :  { %2709 = vmatpush3.bf16.msra.mxu1 %v3497_v10 }
 0x355   :  { %2710 = vmatprep.subr.bf16.mxu1 %v3287_v7 }
 0x358   :  { %2712 = vmatpush3.bf16.msra.mxu1 %v3501_v14 }
 0x359   :  { %2713 = vmatprep.subr.bf16.mxu1 %v3287_v7 }
 0x35c   :  { %2715 = vmatpush3.bf16.msra.mxu1 %v3505_v19 }
 0x35d   :  { %2716 = vmatprep.subr.bf16.mxu1 %v3287_v7 }
 0x360   :  { %2718 = vmatpush3.bf16.msra.mxu1 %v3509_v24 }
 0x361   :  { %2719 = vmatprep.subr.bf16.mxu1 %v3287_v7 }
 0x364   :  { %2721 = vmatpush3.bf16.msra.mxu1 %v3513_v27 }
 0x365   :  { %2722 = vmatprep.subr.bf16.mxu1 %v3287_v7 }
 0x368   :  { %2724 = vmatpush3.bf16.msra.mxu1 %v3518_v32 }
 0x369   :  { %2725 = vmatprep.subr.bf16.mxu1 %v3287_v7 }
 0x36c   :  { %2727 = vmatpush3.bf16.msra.mxu1 %v3522_v35 }
 0x36d   :  { %2760 = vmatprep.subr.bf16.mxu1 %v3287_v7 }
 0x422   :  { %v781_v11 = vpop.f32.mrb[10].mxu1 }
 0x423   :  { %v785_v17 = vadd.f32 %v781_v11, %v3530_v44  ;;  %v2341_v18 = vpop.f32.mrb[11].mxu1  ;;  %v1227_v11 = vld [vmem:[#allocation9 + $0x68] sm:$0xff] }
 0x424   :  { %v1226_v18 = vld [vmem:[#allocation9 + $0x60] sm:$0xff] }
 0x425   :  { %3071 = vtanh.f32 %v785_v17 }
 0x426   :  { %3073 = vrcp.f32 %v688_v13  ;;  %v1229_v13 = vld [vmem:[#allocation9 + $0x78] sm:$0xff] }
 0x427   :  { %v3672_v17 = vpack.c.bf16 %v1229_v13, %v1227_v11  ;;  %v1338_v13 = vld [vmem:[#allocation11 + $0x30] sm:$0xff] }
 0x42f   :  { %v3072_v20 = vpop.eup %3071 }
 0x430   :  { %v787_v21 = vsub.f32 %v579_v37, %v3072_v20  ;;  %v3074_v26 = vpop.eup %3073  ;;  %v3661_v37 = vpack.c.bf16 %v1225_v52, %v1223_v50 }
 0x432   :  { %v788_v28 = vmul.f32 %v3074_v26, %v787_v21  ;;  %v1231_v26 = vld [vmem:[#allocation9 + $0x88] sm:$0xff] }
 0x434   :  { %v789_v31 = vadd.f32 %v3072_v20, %v788_v28  ;;  %v1228_v20 = vld [vmem:[#allocation9 + $0x70] sm:$0xff]  ;;  %v1233_v28 = vld [vmem:[#allocation9 + $0x98] sm:$0xff] }
 0x435   :  { %v3674_v21 = vpack.c.bf16 %v1228_v20, %v1226_v18  ;;  %v1339_v18 = vld [vmem:[#allocation11 + $0x38] sm:$0xff] }
 0x436   :  { %791 = vst [vmem:[#allocation12 + $0x8] sm:$0xff] %v789_v31  ;;  %889 = vmatmul.mubr.f32.vlgmr.msra.gmra.mrb[4].mxu0 %v789_v31  ;;  %v3739_v20 = vpack.c.bf16 %v1339_v18, %v1338_v13 }
 0x437   :  { %2731 = vmatpush1.bf16.msra.mxu0 %v3402_v15  ;;  %1099 = vmatprep.mubr.f32.mxu0 %v3286_v0 }
 0x438   :  { %2733 = vmatprep.subr.bf16.mxu0 %v3405_v16 }
 0x43b   :  { %2735 = vmatpush1.bf16.msra.mxu0 %v3410_v22 }
 0x43c   :  { %2737 = vmatprep.subr.bf16.mxu0 %v3413_v23 }
 0x43f   :  { %2739 = vmatpush1.bf16.msra.mxu0 %v3418_v29 }
 0x440   :  { %2741 = vmatprep.subr.bf16.mxu0 %v3421_v30 }
 0x443   :  { %2743 = vmatpush1.bf16.msra.mxu0 %v3426_v38 }
 0x444   :  { %2745 = vmatprep.subr.bf16.mxu0 %v3429_v40 }
 0x447   :  { %2747 = vmatpush1.bf16.msra.mxu0 %v3434_v46 }
 0x448   :  { %2749 = vmatprep.subr.bf16.mxu0 %v3437_v47 }
 0x44b   :  { %2751 = vmatpush1.bf16.msra.mxu0 %v3444_v53 }
 0x44c   :  { %2753 = vmatprep.subr.bf16.mxu0 %v3447_v54 }
 0x44f   :  { %2755 = vmatpush1.bf16.msra.mxu0 %v3454_v60 }
 0x450   :  { %2757 = vmatprep.subr.bf16.mxu0 %v3457_v61 }
 0x453   :  { %2759 = vmatpush1.bf16.msra.mxu0 %v3464_v2 }
 0x509   :  { %v890_v15 = vpop.f32.mrb[4].mxu0 }
 0x50a   :  { %v892_v16 = vpop.f32.mrb[5].mxu0  ;;  %v3012_v46 = vadd.f32 %v890_v15, %v3566_v25  ;;  %v1230_v15 = vld [vmem:[#allocation9 + $0x80] sm:$0xff] }
 0x50b   :  { %v3013_v22 = vadd.f32 %v892_v16, %v3544_v4  ;;  %v1232_v16 = vld [vmem:[#allocation9 + $0x90] sm:$0xff] }
 0x50c   :  { %v2098_v47 = vmul.f32 -1.442695, %v3012_v46  ;;  %v1239_v46 = vld [vmem:[#allocation9 + $0xc8] sm:$0xff] }
 0x50d   :  { %v2099_v23 = vmul.f32 -1.442695, %v3013_v22  ;;  %v3680_v22 = vpack.c.bf16 %v1232_v16, %v1230_v15  ;;  %v1342_v16 = vld [vmem:[#allocation11 + $0x50] sm:$0xff] }
 0x50f   :  { %3075 = vpow2.f32 %v2099_v23  ;;  %v1235_v23 = vld [vmem:[#allocation9 + $0xa8] sm:$0xff] }
 0x519   :  { %v3076_v29 = vpop.eup %3075 }
 0x51a   :  { %v906_v30 = vadd.f32 1.0, %v3076_v29  ;;  %v1237_v29 = vld [vmem:[#allocation9 + $0xb8] sm:$0xff] }
 0x51c   :  { %3077 = vrcp.f32 %v906_v30  ;;  %v1234_v30 = vld [vmem:[#allocation9 + $0xa0] sm:$0xff] }
 0x51d   :  { %3079 = vpow2.f32 %v2098_v47  ;;  %v1241_v47 = vld [vmem:[#allocation9 + $0xd8] sm:$0xff] }
 0x526   :  { %v3078_v38 = vpop.eup %3077 }
 0x527   :  { %v909_v40 = vmul.f32 %v3078_v38, %v789_v31  ;;  %v3080_v53 = vpop.eup %3079  ;;  %v3683_v38 = vpack.c.bf16 %v1237_v29, %v1235_v23  ;;  %v1343_v23 = vld [vmem:[#allocation11 + $0x58] sm:$0xff] }
 0x528   :  { %v899_v60 = vadd.f32 1.0, %v3080_v53  ;;  %v3747_v29 = vpack.c.bf16 %v1343_v23, %v1342_v16 }
 0x529   :  { %2375 = vmatmul.mubr.f32.vlgmr.msra.gmra.mrb[12].mxu1 %v909_v40  ;;  %v1236_v40 = vld [vmem:[#allocation9 + $0xb0] sm:$0xff] }
 0x52a   :  { %2762 = vmatpush3.bf16.msra.mxu1 %v3492_v6  ;;  %2409 = vmatprep.mubr.msk.f32.mxu1 %vm3288_vm1, %v3286_v0  ;;  %v3686_v53 = vpack.c.bf16 %v1236_v40, %v1234_v30  ;;  %v1344_v30 = vld [vmem:[#allocation11 + $0x60] sm:$0xff]  ;;  %v1345_v40 = vld [vmem:[#allocation11 + $0x68] sm:$0xff] }
 0x52b   :  { %2763 = vmatprep.subr.bf16.mxu1 %v3287_v7 }
 0x52e   :  { %2765 = vmatpush3.bf16.msra.mxu1 %v3497_v10 }
 0x52f   :  { %2766 = vmatprep.subr.bf16.mxu1 %v3287_v7 }
 0x532   :  { %2768 = vmatpush3.bf16.msra.mxu1 %v3501_v14 }
 0x533   :  { %2769 = vmatprep.subr.bf16.mxu1 %v3287_v7 }
 0x536   :  { %2771 = vmatpush3.bf16.msra.mxu1 %v3505_v19 }
 0x537   :  { %2772 = vmatprep.subr.bf16.mxu1 %v3287_v7 }
 0x53a   :  { %2774 = vmatpush3.bf16.msra.mxu1 %v3509_v24 }
 0x53b   :  { %2775 = vmatprep.subr.bf16.mxu1 %v3287_v7 }
 0x53e   :  { %2777 = vmatpush3.bf16.msra.mxu1 %v3513_v27  ;;  %v1215_v27 = vld [vmem:[#allocation9 + $0x8] sm:$0xff] }
 0x53f   :  { %2778 = vmatprep.subr.bf16.mxu1 %v3287_v7 }
 0x542   :  { %2780 = vmatpush3.bf16.msra.mxu1 %v3518_v32  ;;  %v1217_v32 = vld [vmem:[#allocation9 + $0x18] sm:$0xff] }
 0x543   :  { %2781 = vmatprep.subr.bf16.mxu1 %v3287_v7  ;;  %v3650_v44 = vpack.c.bf16 %v1217_v32, %v1215_v27  ;;  %v1244_v27 = vld [vmem:[#allocation9 + $0xf0] sm:$0xff] }
 0x545   :  { %2785 = vmatprep.subr.bf16.mxu0 %v3650_v44 }
 0x546   :  { %2783 = vmatpush3.bf16.msra.mxu1 %v3522_v35  ;;  %v1214_v35 = vld [vmem:[#allocation9] sm:$0xff] }
 0x547   :  { %2816 = vmatprep.subr.bf16.mxu1 %v3287_v7 }
 0x5fc   :  { %v992_v54 = vpop.f32.mrb[12].mxu1 }
 0x5fd   :  { %v996_v61 = vadd.f32 %v992_v54, %v3534_v51  ;;  %v2376_v2 = vpop.f32.mrb[13].mxu1  ;;  %v1216_v51 = vld [vmem:[#allocation9 + $0x10] sm:$0xff]  ;;  %v3689_v54 = vpack.c.bf16 %v1241_v47, %v1239_v46  ;;  %v3750_v46 = vpack.c.bf16 %v1345_v40, %v1344_v30 }
 0x5fe   :  { %v3652_v36 = vpack.c.bf16 %v1216_v51, %v1214_v35  ;;  %v1243_v2 = vld [vmem:[#allocation9 + $0xe8] sm:$0xff]  ;;  %v1346_v47 = vld [vmem:[#allocation11 + $0x70] sm:$0xff] }
 0x5ff   :  { %3081 = vtanh.f32 %v996_v61  ;;  %v1240_v61 = vld [vmem:[#allocation9 + $0xd0] sm:$0xff] }
 0x600   :  { %3083 = vrcp.f32 %v899_v60  ;;  %v1238_v60 = vld [vmem:[#allocation9 + $0xc0] sm:$0xff] }
 0x609   :  { %v3082_v6 = vpop.eup %3081 }
 0x60a   :  { %v998_v10 = vsub.f32 %v789_v31, %v3082_v6  ;;  %v3084_v14 = vpop.eup %3083  ;;  %v3678_v31 = vpack.c.bf16 %v1233_v28, %v1231_v26  ;;  %v1340_v26 = vld [vmem:[#allocation11 + $0x40] sm:$0xff]  ;;  %v1341_v28 = vld [vmem:[#allocation11 + $0x48] sm:$0xff] }
 0x60b   :  { %v3743_v15 = vpack.c.bf16 %v1341_v28, %v1340_v26 }
 0x60c   :  { %v999_v19 = vmul.f32 %v3084_v14, %v998_v10  ;;  %v3692_v10 = vpack.c.bf16 %v1240_v61, %v1238_v60  ;;  %v1347_v60 = vld [vmem:[#allocation11 + $0x78] sm:$0xff] }
 0x60d   :  { %v3754_v61 = vpack.c.bf16 %v1347_v60, %v1346_v47 }
 0x60e   :  { %v3645_v24 = vadd.f32 %v3082_v6, %v999_v19  ;;  %v1245_v6 = vld [vmem:[#allocation9 + $0xf8] sm:$0xff]  ;;  %v1242_v19 = vld [vmem:[#allocation9 + $0xe0] sm:$0xff] }
 0x60f   :  { %v3695_v14 = vpack.c.bf16 %v1245_v6, %v1243_v2  ;;  %v3698_v32 = vpack.c.bf16 %v1244_v27, %v1242_v19 }
 0x610   :  { %1002 = vst [vmem:[#allocation12 + $0x10] sm:$0xff] %v3645_v24  ;;  %1100 = vmatmul.mubr.f32.vlgmr.msra.gmra.mrb[6].mxu0 %v3645_v24 }
 0x611   :  { %1310 = vmatprep.mubr.f32.mxu0 %v3286_v0  ;;  %2787 = vmatpush1.bf16.msra.mxu0 %v3652_v36 }
 0x612   :  { %2789 = vmatprep.subr.bf16.mxu0 %v3654_v39 }
 0x615   :  { %2791 = vmatpush1.bf16.msra.mxu0 %v3658_v56 }
 0x616   :  { %2793 = vmatprep.subr.bf16.mxu0 %v3661_v37 }
 0x619   :  { %2795 = vmatpush1.bf16.msra.mxu0 %v3664_v42 }
 0x61a   :  { %2797 = vmatprep.subr.bf16.mxu0 %v3672_v17 }
 0x61d   :  { %2799 = vmatpush1.bf16.msra.mxu0 %v3674_v21 }
 0x61e   :  { %2801 = vmatprep.subr.bf16.mxu0 %v3678_v31 }
 0x621   :  { %2803 = vmatpush1.bf16.msra.mxu0 %v3680_v22 }
 0x622   :  { %2805 = vmatprep.subr.bf16.mxu0 %v3683_v38 }
 0x625   :  { %2807 = vmatpush1.bf16.msra.mxu0 %v3686_v53 }
 0x626   :  { %2809 = vmatprep.subr.bf16.mxu0 %v3689_v54 }
 0x629   :  { %2811 = vmatpush1.bf16.msra.mxu0 %v3692_v10 }
 0x62a   :  { %2813 = vmatprep.subr.bf16.mxu0 %v3695_v14 }
 0x62d   :  { %2815 = vmatpush1.bf16.msra.mxu0 %v3698_v32 }
 0x62e   :  { %2841 = vmatprep.subr.bf16.mxu0 %v3650_v44 }
 0x6e3   :  { %v1101_v45 = vpop.f32.mrb[6].mxu0 }
 0x6e4   :  { %v1103_v58 = vpop.f32.mrb[7].mxu0  ;;  %v3014_v35 = vadd.f32 %v1101_v45, %v3566_v25 }
 0x6e5   :  { %v3015_v59 = vadd.f32 %v1103_v58, %v3544_v4 }
 0x6e6   :  { %v2100_v51 = vmul.f32 -1.442695, %v3014_v35 }
 0x6e7   :  { %v2101_v63 = vmul.f32 -1.442695, %v3015_v59 }
 0x6e9   :  { %3085 = vpow2.f32 %v2101_v63  ;;  %v1334_v63 = vld [vmem:[#allocation11 + $0x10] sm:$0xff] }
 0x6f3   :  { %v3086_v5 = vpop.eup %3085 }
 0x6f4   :  { %v1117_v12 = vadd.f32 1.0, %v3086_v5  ;;  %v1335_v5 = vld [vmem:[#allocation11 + $0x18] sm:$0xff] }
 0x6f6   :  { %3087 = vrcp.f32 %v1117_v12  ;;  %v3731_v12 = vpack.c.bf16 %v1335_v5, %v1334_v63 }
 0x6f7   :  { %3089 = vpow2.f32 %v2100_v51 }
 0x700   :  { %v3088_v8 = vpop.eup %3087 }
 0x701   :  { %v1120_v9 = vmul.f32 %v3088_v8, %v3645_v24  ;;  %v3090_v33 = vpop.eup %3089  ;;  %v1336_v8 = vld [vmem:[#allocation11 + $0x20] sm:$0xff] }
 0x702   :  { %v1110_v43 = vadd.f32 1.0, %v3090_v33 }
 0x703   :  { %2410 = vmatmul.mubr.f32.vlgmr.msra.gmra.mrb[14].mxu1 %v1120_v9  ;;  %v1337_v9 = vld [vmem:[#allocation11 + $0x28] sm:$0xff] }
 0x704   :  { %2444 = vmatprep.mubr.msk.f32.mxu1 %vm3288_vm1, %v3286_v0  ;;  %v3735_v11 = vpack.c.bf16 %v1337_v9, %v1336_v8 }
 0x7d6   :  { %v1203_v34 = vpop.f32.mrb[14].mxu1 }
 0x7d7   :  { %v1207_v48 = vadd.f32 %v1203_v34, %v3532_v49  ;;  %v2411_v50 = vpop.f32.mrb[15].mxu1  ;;  %v1332_v49 = vld [vmem:[#allocation11] sm:$0xff] }
 0x7d9   :  { %3091 = vtanh.f32 %v1207_v48 }
 0x7da   :  { %3093 = vrcp.f32 %v1110_v43 }
 0x7e3   :  { %v3092_v52 = vpop.eup %3091 }
 0x7e4   :  { %v1209_v3 = vsub.f32 %v3645_v24, %v3092_v52  ;;  %v3094_v41 = vpop.eup %3093  ;;  %v1333_v24 = vld [vmem:[#allocation11 + $0x8] sm:$0xff] }
 0x7e5   :  { %v3727_v45 = vpack.c.bf16 %v1333_v24, %v1332_v49 }
 0x7e6   :  { %v1210_v58 = vmul.f32 %v3094_v41, %v1209_v3 }
 0x7e7   :  { %2818 = vmatpush3.bf16.msra.mxu1 %v3727_v45 }
 0x7e8   :  { %v3706_v59 = vadd.f32 %v3092_v52, %v1210_v58  ;;  %2819 = vmatprep.subr.bf16.mxu1 %v3287_v7 }
 0x7ea   :  { %1213 = vst [vmem:[#allocation12 + $0x18] sm:$0xff] %v3706_v59  ;;  %1311 = vmatmul.mubr.f32.vlgmr.msra.gmra.mrb[8].mxu0 %v3706_v59 }
 0x7eb   :  { %2843 = vmatpush1.bf16.msra.mxu0 %v3652_v36  ;;  %1521 = vmatprep.mubr.f32.mxu0 %v3286_v0 }
 0x7ec   :  { %2845 = vmatprep.subr.bf16.mxu0 %v3654_v39  ;;  %2821 = vmatpush3.bf16.msra.mxu1 %v3731_v12 }
 0x7ed   :  { %2822 = vmatprep.subr.bf16.mxu1 %v3287_v7 }
 0x7ef   :  { %2847 = vmatpush1.bf16.msra.mxu0 %v3658_v56 }
 0x7f0   :  { %2849 = vmatprep.subr.bf16.mxu0 %v3661_v37  ;;  %2824 = vmatpush3.bf16.msra.mxu1 %v3735_v11 }
 0x7f1   :  { %2825 = vmatprep.subr.bf16.mxu1 %v3287_v7 }
 0x7f3   :  { %2851 = vmatpush1.bf16.msra.mxu0 %v3664_v42 }
 0x7f4   :  { %2853 = vmatprep.subr.bf16.mxu0 %v3672_v17  ;;  %2827 = vmatpush3.bf16.msra.mxu1 %v3739_v20 }
 0x7f5   :  { %2828 = vmatprep.subr.bf16.mxu1 %v3287_v7 }
 0x7f7   :  { %2855 = vmatpush1.bf16.msra.mxu0 %v3674_v21 }
 0x7f8   :  { %2857 = vmatprep.subr.bf16.mxu0 %v3678_v31  ;;  %2830 = vmatpush3.bf16.msra.mxu1 %v3743_v15 }
 0x7f9   :  { %2831 = vmatprep.subr.bf16.mxu1 %v3287_v7 }
 0x7fb   :  { %2859 = vmatpush1.bf16.msra.mxu0 %v3680_v22 }
 0x7fc   :  { %2861 = vmatprep.subr.bf16.mxu0 %v3683_v38  ;;  %2833 = vmatpush3.bf16.msra.mxu1 %v3747_v29 }
 0x7fd   :  { %2834 = vmatprep.subr.bf16.mxu1 %v3287_v7 }
 0x7ff   :  { %2863 = vmatpush1.bf16.msra.mxu0 %v3686_v53 }
 0x800   :  { %2865 = vmatprep.subr.bf16.mxu0 %v3689_v54  ;;  %2836 = vmatpush3.bf16.msra.mxu1 %v3750_v46 }
 0x801   :  { %2837 = vmatprep.subr.bf16.mxu1 %v3287_v7 }
 0x803   :  { %2867 = vmatpush1.bf16.msra.mxu0 %v3692_v10 }
 0x804   :  { %2869 = vmatprep.subr.bf16.mxu0 %v3695_v14  ;;  %2839 = vmatpush3.bf16.msra.mxu1 %v3754_v61 }
 0x805   :  { %2872 = vmatprep.subr.bf16.mxu1 %v3287_v7 }
 0x807   :  { %2871 = vmatpush1.bf16.msra.mxu0 %v3698_v32 }
 0x808   :  { %2897 = vmatprep.subr.bf16.mxu0 %v3650_v44 }
 0x8bd   :  { %v1312_v2 = vpop.f32.mrb[8].mxu0 }
 0x8be   :  { %v1314_v6 = vpop.f32.mrb[9].mxu0  ;;  %v3016_v43 = vadd.f32 %v1312_v2, %v3566_v25 }
 0x8bf   :  { %v3017_v19 = vadd.f32 %v1314_v6, %v3544_v4 }
 0x8c0   :  { %v2102_v48 = vmul.f32 -1.442695, %v3016_v43 }
 0x8c1   :  { %v2103_v27 = vmul.f32 -1.442695, %v3017_v19 }
 0x8c3   :  { %3095 = vpow2.f32 %v2103_v27 }
 0x8cd   :  { %v3096_v35 = vpop.eup %3095 }
 0x8ce   :  { %v1328_v51 = vadd.f32 1.0, %v3096_v35 }
 0x8d0   :  { %3097 = vrcp.f32 %v1328_v51 }
 0x8d1   :  { %3099 = vpow2.f32 %v2102_v48 }
 0x8da   :  { %v3098_v33 = vpop.eup %3097 }
 0x8db   :  { %v1331_v34 = vmul.f32 %v3098_v33, %v3706_v59  ;;  %v3100_v50 = vpop.eup %3099 }
 0x8dc   :  { %v1321_v3 = vadd.f32 1.0, %v3100_v50 }
 0x8dd   :  { %2445 = vmatmul.mubr.f32.vlgmr.msra.gmra.mrb[16].mxu1 %v1331_v34 }
 0x8de   :  { %2874 = vmatpush3.bf16.msra.mxu1 %v3727_v45  ;;  %2479 = vmatprep.mubr.msk.f32.mxu1 %vm3288_vm1, %v3286_v0 }
 0x8df   :  { %2875 = vmatprep.subr.bf16.mxu1 %v3287_v7 }
 0x8e2   :  { %2877 = vmatpush3.bf16.msra.mxu1 %v3731_v12 }
 0x8e3   :  { %2878 = vmatprep.subr.bf16.mxu1 %v3287_v7 }
 0x8e6   :  { %2880 = vmatpush3.bf16.msra.mxu1 %v3735_v11 }
 0x8e7   :  { %2881 = vmatprep.subr.bf16.mxu1 %v3287_v7 }
 0x8ea   :  { %2883 = vmatpush3.bf16.msra.mxu1 %v3739_v20 }
 0x8eb   :  { %2884 = vmatprep.subr.bf16.mxu1 %v3287_v7 }
 0x8ee   :  { %2886 = vmatpush3.bf16.msra.mxu1 %v3743_v15 }
 0x8ef   :  { %2887 = vmatprep.subr.bf16.mxu1 %v3287_v7 }
 0x8f2   :  { %2889 = vmatpush3.bf16.msra.mxu1 %v3747_v29 }
 0x8f3   :  { %2890 = vmatprep.subr.bf16.mxu1 %v3287_v7 }
 0x8f6   :  { %2892 = vmatpush3.bf16.msra.mxu1 %v3750_v46 }
 0x8f7   :  { %2893 = vmatprep.subr.bf16.mxu1 %v3287_v7 }
 0x8fa   :  { %2895 = vmatpush3.bf16.msra.mxu1 %v3754_v61 }
 0x8fb   :  { %2928 = vmatprep.subr.bf16.mxu1 %v3287_v7 }
 0x9b0   :  { %v1414_v52 = vpop.f32.mrb[16].mxu1 }
 0x9b1   :  { %v1418_v41 = vadd.f32 %v1414_v52, %v3538_v57  ;;  %v2446_v58 = vpop.f32.mrb[17].mxu1 }
 0x9b3   :  { %3101 = vtanh.f32 %v1418_v41 }
 0x9b4   :  { %3103 = vrcp.f32 %v1321_v3 }
 0x9bd   :  { %v3102_v49 = vpop.eup %3101 }
 0x9be   :  { %v1420_v24 = vsub.f32 %v3706_v59, %v3102_v49  ;;  %v3104_v63 = vpop.eup %3103 }
 0x9c0   :  { %v1421_v5 = vmul.f32 %v3104_v63, %v1420_v24 }
 0x9c2   :  { %v1422_v8 = vadd.f32 %v3102_v49, %v1421_v5 }
 0x9c4   :  { %1424 = vst [vmem:[#allocation12 + $0x20] sm:$0xff] %v1422_v8  ;;  %1522 = vmatmul.mubr.f32.vlgmr.msra.gmra.mrb[10].mxu0 %v1422_v8 }
 0x9c5   :  { %2899 = vmatpush1.bf16.msra.mxu0 %v3652_v36  ;;  %1732 = vmatprep.mubr.f32.mxu0 %v3286_v0 }
 0x9c6   :  { %2901 = vmatprep.subr.bf16.mxu0 %v3654_v39 }
 0x9c9   :  { %2903 = vmatpush1.bf16.msra.mxu0 %v3658_v56 }
 0x9ca   :  { %2905 = vmatprep.subr.bf16.mxu0 %v3661_v37 }
 0x9cd   :  { %2907 = vmatpush1.bf16.msra.mxu0 %v3664_v42 }
 0x9ce   :  { %2909 = vmatprep.subr.bf16.mxu0 %v3672_v17 }
 0x9d1   :  { %2911 = vmatpush1.bf16.msra.mxu0 %v3674_v21 }
 0x9d2   :  { %2913 = vmatprep.subr.bf16.mxu0 %v3678_v31 }
 0x9d5   :  { %2915 = vmatpush1.bf16.msra.mxu0 %v3680_v22 }
 0x9d6   :  { %2917 = vmatprep.subr.bf16.mxu0 %v3683_v38 }
 0x9d9   :  { %2919 = vmatpush1.bf16.msra.mxu0 %v3686_v53 }
 0x9da   :  { %2921 = vmatprep.subr.bf16.mxu0 %v3689_v54 }
 0x9dd   :  { %2923 = vmatpush1.bf16.msra.mxu0 %v3692_v10 }
 0x9de   :  { %2925 = vmatprep.subr.bf16.mxu0 %v3695_v14 }
 0x9e1   :  { %2927 = vmatpush1.bf16.msra.mxu0 %v3698_v32 }
 0x9e2   :  { %2953 = vmatprep.subr.bf16.mxu0 %v3650_v44 }
 0xa97   :  { %v1523_v57 = vpop.f32.mrb[10].mxu0 }
 0xa98   :  { %v1525_v59 = vpop.f32.mrb[11].mxu0  ;;  %v3018_v44 = vadd.f32 %v1523_v57, %v3566_v25 }
 0xa99   :  { %v3019_v9 = vadd.f32 %v1525_v59, %v3544_v4 }
 0xa9a   :  { %v2104_v23 = vmul.f32 -1.442695, %v3018_v44 }
 0xa9b   :  { %v2105_v13 = vmul.f32 -1.442695, %v3019_v9 }
 0xa9d   :  { %3105 = vpow2.f32 %v2105_v13 }
 0xaa7   :  { %v3106_v18 = vpop.eup %3105 }
 0xaa8   :  { %v1539_v26 = vadd.f32 1.0, %v3106_v18 }
 0xaaa   :  { %3107 = vrcp.f32 %v1539_v26 }
 0xaab   :  { %3109 = vpow2.f32 %v2104_v23 }
 0xab4   :  { %v3108_v28 = vpop.eup %3107 }
 0xab5   :  { %v1542_v16 = vmul.f32 %v3108_v28, %v1422_v8  ;;  %v3110_v30 = vpop.eup %3109 }
 0xab6   :  { %v1532_v47 = vadd.f32 1.0, %v3110_v30 }
 0xab7   :  { %2480 = vmatmul.mubr.f32.vlgmr.msra.gmra.mrb[18].mxu1 %v1542_v16 }
 0xab8   :  { %2930 = vmatpush3.bf16.msra.mxu1 %v3727_v45  ;;  %2514 = vmatprep.mubr.msk.f32.mxu1 %vm3288_vm1, %v3286_v0 }
 0xab9   :  { %2931 = vmatprep.subr.bf16.mxu1 %v3287_v7 }
 0xabc   :  { %2933 = vmatpush3.bf16.msra.mxu1 %v3731_v12 }
 0xabd   :  { %2934 = vmatprep.subr.bf16.mxu1 %v3287_v7 }
 0xac0   :  { %2936 = vmatpush3.bf16.msra.mxu1 %v3735_v11 }
 0xac1   :  { %2937 = vmatprep.subr.bf16.mxu1 %v3287_v7 }
 0xac4   :  { %2939 = vmatpush3.bf16.msra.mxu1 %v3739_v20 }
 0xac5   :  { %2940 = vmatprep.subr.bf16.mxu1 %v3287_v7 }
 0xac8   :  { %2942 = vmatpush3.bf16.msra.mxu1 %v3743_v15 }
 0xac9   :  { %2943 = vmatprep.subr.bf16.mxu1 %v3287_v7 }
 0xacc   :  { %2945 = vmatpush3.bf16.msra.mxu1 %v3747_v29 }
 0xacd   :  { %2946 = vmatprep.subr.bf16.mxu1 %v3287_v7 }
 0xad0   :  { %2948 = vmatpush3.bf16.msra.mxu1 %v3750_v46 }
 0xad1   :  { %2949 = vmatprep.subr.bf16.mxu1 %v3287_v7 }
 0xad4   :  { %2951 = vmatpush3.bf16.msra.mxu1 %v3754_v61 }
 0xad5   :  { %2984 = vmatprep.subr.bf16.mxu1 %v3287_v7 }
 0xb8a   :  { %v1625_v40 = vpop.f32.mrb[18].mxu1 }
 0xb8b   :  { %v1629_v60 = vadd.f32 %v1625_v40, %v3536_v55  ;;  %v2481_v2 = vpop.f32.mrb[19].mxu1 }
 0xb8d   :  { %3111 = vtanh.f32 %v1629_v60 }
 0xb8e   :  { %3113 = vrcp.f32 %v1532_v47 }
 0xb97   :  { %v3112_v6 = vpop.eup %3111 }
 0xb98   :  { %v1631_v19 = vsub.f32 %v1422_v8, %v3112_v6  ;;  %v3114_v27 = vpop.eup %3113 }
 0xb9a   :  { %v1632_v35 = vmul.f32 %v3114_v27, %v1631_v19 }
 0xb9c   :  { %v1633_v51 = vadd.f32 %v3112_v6, %v1632_v35 }
 0xb9e   :  { %1635 = vst [vmem:[#allocation12 + $0x28] sm:$0xff] %v1633_v51  ;;  %1733 = vmatmul.mubr.f32.vlgmr.msra.gmra.mrb[12].mxu0 %v1633_v51 }
 0xb9f   :  { %2955 = vmatpush1.bf16.msra.mxu0 %v3652_v36  ;;  %1943 = vmatprep.mubr.f32.mxu0 %v3286_v0 }
 0xba0   :  { %2957 = vmatprep.subr.bf16.mxu0 %v3654_v39 }
 0xba3   :  { %2959 = vmatpush1.bf16.msra.mxu0 %v3658_v56 }
 0xba4   :  { %2961 = vmatprep.subr.bf16.mxu0 %v3661_v37 }
 0xba7   :  { %2963 = vmatpush1.bf16.msra.mxu0 %v3664_v42 }
 0xba8   :  { %2965 = vmatprep.subr.bf16.mxu0 %v3672_v17 }
 0xbab   :  { %2967 = vmatpush1.bf16.msra.mxu0 %v3674_v21 }
 0xbac   :  { %2969 = vmatprep.subr.bf16.mxu0 %v3678_v31 }
 0xbaf   :  { %2971 = vmatpush1.bf16.msra.mxu0 %v3680_v22 }
 0xbb0   :  { %2973 = vmatprep.subr.bf16.mxu0 %v3683_v38 }
 0xbb3   :  { %2975 = vmatpush1.bf16.msra.mxu0 %v3686_v53 }
 0xbb4   :  { %2977 = vmatprep.subr.bf16.mxu0 %v3689_v54 }
 0xbb7   :  { %2979 = vmatpush1.bf16.msra.mxu0 %v3692_v10 }
 0xbb8   :  { %2981 = vmatprep.subr.bf16.mxu0 %v3695_v14 }
 0xbbb   :  { %2983 = vmatpush1.bf16.msra.mxu0 %v3698_v32 }
 0xc71   :  { %v1734_v55 = vpop.f32.mrb[12].mxu0 }
 0xc72   :  { %v1736_v36 = vpop.f32.mrb[13].mxu0 }
 0xc73   :  { %v3021_v39 = vadd.f32 %v1736_v36, %v3544_v4 }
 0xc75   :  { %v2107_v56 = vmul.f32 -1.442695, %v3021_v39 }
 0xc77   :  { %3115 = vpow2.f32 %v2107_v56 }
 0xc81   :  { %v3116_v37 = vpop.eup %3115 }
 0xc82   :  { %v1750_v42 = vadd.f32 1.0, %v3116_v37 }
 0xc84   :  { %3117 = vrcp.f32 %v1750_v42 }
 0xc8e   :  { %v3118_v17 = vpop.eup %3117 }
 0xc8f   :  { %v1753_v21 = vmul.f32 %v3118_v17, %v1633_v51 }
 0xc91   :  { %2515 = vmatmul.mubr.f32.vlgmr.msra.gmra.mrb[20].mxu1 %v1753_v21 }
 0xc92   :  { %2986 = vmatpush3.bf16.msra.mxu1 %v3727_v45  ;;  %2549 = vmatprep.mubr.msk.f32.mxu1 %vm3288_vm1, %v3286_v0  ;;  %v3020_v0 = vadd.f32 %v1734_v55, %v3566_v25 }
 0xc93   :  { %2987 = vmatprep.subr.bf16.mxu1 %v3287_v7 }
 0xc94   :  { %v2106_v31 = vmul.f32 -1.442695, %v3020_v0 }
 0xc96   :  { %2989 = vmatpush3.bf16.msra.mxu1 %v3731_v12  ;;  %3119 = vpow2.f32 %v2106_v31 }
 0xc97   :  { %2990 = vmatprep.subr.bf16.mxu1 %v3287_v7 }
 0xc9a   :  { %2992 = vmatpush3.bf16.msra.mxu1 %v3735_v11 }
 0xc9b   :  { %2993 = vmatprep.subr.bf16.mxu1 %v3287_v7 }
 0xc9e   :  { %2995 = vmatpush3.bf16.msra.mxu1 %v3739_v20 }
 0xc9f   :  { %2996 = vmatprep.subr.bf16.mxu1 %v3287_v7 }
 0xca0   :  { %v3120_v22 = vpop.eup %3119 }
 0xca1   :  { %v1743_v53 = vadd.f32 1.0, %v3120_v22 }
 0xca2   :  { %2998 = vmatpush3.bf16.msra.mxu1 %v3743_v15 }
 0xca3   :  { %2999 = vmatprep.subr.bf16.mxu1 %v3287_v7 }
 0xca6   :  { %3001 = vmatpush3.bf16.msra.mxu1 %v3747_v29 }
 0xca7   :  { %3002 = vmatprep.subr.bf16.mxu1 %v3287_v7 }
 0xcaa   :  { %3004 = vmatpush3.bf16.msra.mxu1 %v3750_v46 }
 0xcab   :  { %3005 = vmatprep.subr.bf16.mxu1 %v3287_v7 }
 0xcae   :  { %3007 = vmatpush3.bf16.msra.mxu1 %v3754_v61 }
 0xd64   :  { %v1836_v38 = vpop.f32.mrb[20].mxu1 }
 0xd65   :  { %v1840_v54 = vadd.f32 %v1836_v38, %v3542_v1  ;;  %v2516_v10 = vpop.f32.mrb[21].mxu1 }
 0xd67   :  { %3121 = vtanh.f32 %v1840_v54 }
 0xd68   :  { %3123 = vrcp.f32 %v1743_v53 }
 0xd71   :  { %v3122_v14 = vpop.eup %3121 }
 0xd72   :  { %v1842_v32 = vsub.f32 %v1633_v51, %v3122_v14  ;;  %v3124_v45 = vpop.eup %3123 }
 0xd74   :  { %v1843_v12 = vmul.f32 %v3124_v45, %v1842_v32 }
 0xd76   :  { %v1844_v11 = vadd.f32 %v3122_v14, %v1843_v12 }
 0xd78   :  { %1846 = vst [vmem:[#allocation12 + $0x30] sm:$0xff] %v1844_v11  ;;  %1944 = vmatmul.mubr.f32.vlgmr.msra.gmra.mrb[14].mxu0 %v1844_v11 }
 0xe4b   :  { %v1945_v7 = vpop.f32.mrb[14].mxu0 }
 0xe4c   :  { %v1947_v20 = vpop.f32.mrb[15].mxu0  ;;  %v3022_v34 = vadd.f32 %v1945_v7, %v3566_v25 }
 0xe4d   :  { %v3023_v15 = vadd.f32 %v1947_v20, %v3544_v4 }
 0xe4e   :  { %v2108_v43 = vmul.f32 -1.442695, %v3022_v34 }
 0xe4f   :  { %v2109_v29 = vmul.f32 -1.442695, %v3023_v15 }
 0xe51   :  { %3125 = vpow2.f32 %v2109_v29 }
 0xe5b   :  { %v3126_v46 = vpop.eup %3125 }
 0xe5c   :  { %v1961_v61 = vadd.f32 1.0, %v3126_v46 }
 0xe5e   :  { %3127 = vrcp.f32 %v1961_v61 }
 0xe5f   :  { %3129 = vpow2.f32 %v2108_v43 }
 0xe68   :  { %v3128_v1 = vpop.eup %3127 }
 0xe69   :  { %v1964_v33 = vmul.f32 %v3128_v1, %v1844_v11  ;;  %v3130_v48 = vpop.eup %3129 }
 0xe6a   :  { %v1954_v52 = vadd.f32 1.0, %v3130_v48 }
 0xe6b   :  { %2550 = vmatmul.mubr.f32.vlgmr.msra.gmra.mrb[22].mxu1 %v1964_v33 }
 0xf3e   :  { %v2047_v50 = vpop.f32.mrb[22].mxu1 }
 0xf3f   :  { %v2051_v3 = vadd.f32 %v2047_v50, %v3540_v62  ;;  %v2551_v41 = vpop.f32.mrb[23].mxu1 }
 0xf41   :  { %3131 = vtanh.f32 %v2051_v3 }
 0xf42   :  { %3133 = vrcp.f32 %v1954_v52 }
 0xf4b   :  { %v3132_v4 = vpop.eup %3131 }
 0xf4c   :  { %v2053_v58 = vsub.f32 %v1844_v11, %v3132_v4  ;;  %v3134_v49 = vpop.eup %3133 }
 0xf4e   :  { %v2054_v24 = vmul.f32 %v3134_v49, %v2053_v58 }
 0xf50   :  { %v2055_v63 = vadd.f32 %v3132_v4, %v2054_v24 }
 0xf52   :  { %2057 = vst [vmem:[#allocation12 + $0x38] sm:$0xff] %v2055_v63 }
 0xf53   :  { %3256 = shalt.err (!%p3253_p2)
}
 0xf54   :  { %s3257_s16 = scalar_lea.hbm %s3880_s6, 1024 }
 0xf55   :  { %p3258_p3 = scmp.ne.s32.totalorder %s3880_s6, %s3257_s16  ;;  %p3261_p4 = scmp.lt.u32.totalorder %s3257_s16, %s3880_s6 }
 0xf57   :  { %p3263_p5 = pnand %p3261_p4, %p3258_p3 }
 0xf59   :  { %3266 = shalt.err (!%p3263_p5)
}
 0xf5a   :  { %2070 = dma.vmem_to_hbm [thread:$0]  %s2065_s12, 1024, %s3880_s6, [#allocation5], %s3280_s3, %s3280_s3, %s3281_s24  }
 0xf5b   :  { %3273 = dma.done.wait [#allocation5], 1024  }
 0xf5c   :  { %3274 = vsyncadd [#allocation5], 4294966272 }
 0xf5d   :  { %2074 = vsyncpa [#allocation4], 1 }
 0xf5e   :  { %2075 = vsyncpa [#allocation7], 1 }
 0xf5f   :  { %2076 = vsyncpa [#allocation10], 1 }
 0xf60   :  { %2077 = vsyncpa [#allocation5], 1 }

</bundles_post_ra>
